<compile_context>
chip_gen: v7x
topology: tpu7x:2x2x1
jax: 0.10.0
libtpu: 0.0.40
codegen_flags: <defaults>
</compile_context>

<pallas_src>
import functools

import numpy as np

import jax
import jax.numpy as jnp
from jax.experimental import pallas as pl
from jax.experimental.pallas import tpu as pltpu

NUM_OPS = 6
BN_EPS = 1e-5
NEG_INF = -1e30


# ---------------------------------------------------------------------------
# DAG / routing helpers
# ---------------------------------------------------------------------------
def generate_nodes(cell_nodes):
    starts, ends = [], []
    for j in range(1, cell_nodes):
        for i in range(j):
            starts.append(i)
            ends.append(j)
    return starts, ends


def build_edge_meta(starts, ends, cell_nodes):
    """Per-edge routing: [src, dst_slot, is_first_into_dst, is_final, out_slot]."""
    last = cell_nodes - 1
    n_edges = len(starts)
    meta = np.zeros((n_edges, 5), np.int32)
    seen = set()
    slot = 0
    for k in range(n_edges):
        src, dst = starts[k], ends[k]
        is_final = int(dst == last)
        first = int(dst not in seen)
        seen.add(dst)
        meta[k] = (src, 0 if is_final else dst, first, is_final,
                   slot if is_final else 0)
        if is_final:
            slot += 1
    return meta


# ---------------------------------------------------------------------------
# Wrapper-side weight re-packing (banded / block-diagonal matrices)
# ---------------------------------------------------------------------------
def build_banded_conv_weights(w3, w5, width):
    """(E,3,3,C,C)+(E,5,5,C,C) -> (E, 5, W*C, 2*W*C) bf16 block-banded.

    Band[kh][w'*C+ci, w*C+co] = Wt[kh, w'-w+2, ci, co] when the tap is in
    range (columns [0:W*C] -> 3x3 branch, [W*C:2*W*C] -> 5x5 branch), so one
    matmul per kh handles all kw taps, all input channels and the W-axis zero
    padding at once.
    """
    n_edges, _, _, c, _ = w3.shape
    w3e = jnp.zeros((n_edges, 5, 5, c, c), w3.dtype).at[:, 1:4, 1:4].set(w3)

    t = np.zeros((5, width, width), np.float32)
    for kw in range(5):
        for w in range(width):
            wp = w + kw - 2
            if 0 <= wp < width:
                t[kw, wp, w] = 1.0
    t = jnp.asarray(t)

    def band(wt):
        b = jnp.einsum('kpw,ehkio->ehpiwo', t, wt)
        return b.reshape(n_edges, 5, width * c, width * c)

    return jnp.concatenate([band(w3e), band(w5)], axis=-1).astype(jnp.bfloat16)


def build_block_diag_1x1(wfix, width):
    """(Cin, C) 1x1-conv weight -> (W*Cin, W*C) block-diagonal matrix."""
    cin, c = wfix.shape
    b = jnp.einsum('wv,io->wivo', jnp.eye(width, dtype=wfix.dtype), wfix)
    return b.reshape(width * cin, width * c)


# ---------------------------------------------------------------------------
# Fused cell kernel: grid = (num_edges,), topological edge order
# ---------------------------------------------------------------------------
def _cell_kernel(meta_ref, x_ref, wfix_ref, sel_ref, selt_ref, opw_ref,
                 wband_ref, out_ref, feats_ref, xp0_ref, xpm_ref,
                 *, B, H, W, C):
    e = pl.program_id(0)
    BH = B * H
    WC = W * C
    inv_n = 1.0 / float(B * H * W)

    # -- folded BatchNorm2d(affine=False), batch statistics, per branch -----
    def bn_scale_shift(branches):
        k = len(branches)
        sums = [jnp.sum(y, axis=0, keepdims=True) for y in branches]
        sqs = [jnp.sum(y * y, axis=0, keepdims=True) for y in branches]
        stats = jnp.concatenate(sums + sqs, axis=0)                 # (2k, WC)
        pad = (-2 * k) % 8
        if pad:
            stats = jnp.concatenate(
                [stats, jnp.zeros((pad, WC), jnp.float32)], axis=0)
        per = jnp.dot(stats, sel_ref[...],
                      preferred_element_type=jnp.float32) * inv_n   # (., C)
        mean = per[:k]
        ex2 = per[k:2 * k]
        var = jnp.maximum(ex2 - mean * mean, 0.0)                   # clamp
        scale = jax.lax.rsqrt(var + BN_EPS)
        shift = -mean * scale
        both = jnp.concatenate([scale, shift], axis=0)              # (2k, C)
        if pad:
            both = jnp.concatenate(
                [both, jnp.zeros((pad, C), jnp.float32)], axis=0)
        lanes = jnp.dot(both, selt_ref[...],
                        preferred_element_type=jnp.float32)         # (., WC)
        return lanes[:k], lanes[k:2 * k]

    # -- one-time init: pad halos + node-0 feature (ChannelFixer) -----------
    @pl.when(e == 0)
    def _init():
        xp0_ref[...] = jnp.zeros_like(xp0_ref)              # zero H halo
        xpm_ref[...] = jnp.full_like(xpm_ref, NEG_INF)      # -inf H halo
        y0 = jnp.dot(x_ref[...].astype(jnp.bfloat16), wfix_ref[...],
                     preferred_element_type=jnp.float32)    # (BH, WC)
        sc, sh = bn_scale_shift([y0])
        feats_ref[0] = y0 * sc[0:1] + sh[0:1]

    # -- per-edge routing scalars (SMEM) -------------------------------------
    src = meta_ref[e, 0]
    dst = meta_ref[e, 1]
    is_first = meta_ref[e, 2]
    is_final = meta_ref[e, 3]
    slot = meta_ref[e, 4]

    x = feats_ref[src]                                       # (BH, WC)
    x3 = x.reshape(B, H, WC)
    xp0_ref[:, 2:2 + H, :] = x3                              # lane-aligned
    xpm_ref[:, 1:1 + H, :] = x3                              # lane-aligned

    # -- 3x3 + 5x5 convs: 5 banded matmuls (W taps + W pad folded in weights)
    conv = None
    for kh in range(5):
        slab = xp0_ref[:, kh:kh + H, :].reshape(BH, WC).astype(jnp.bfloat16)
        part = jnp.dot(slab, wband_ref[0, kh],
                       preferred_element_type=jnp.float32)   # (BH, 2*WC)
        conv = part if conv is None else conv + part
    c3 = conv[:, :WC]
    c5 = conv[:, WC:]

    # -- separable 3x3 pools: H from padded buffers, W via lane shifts ------
    def wshift(row, s, fill):
        k = abs(s) * C
        f = jnp.full((BH, k), fill, jnp.float32)
        if s > 0:
            return jnp.concatenate([row[:, k:], f], axis=1)
        return jnp.concatenate([f, row[:, :WC - k]], axis=1)

    mh = jnp.maximum(jnp.maximum(xpm_ref[:, 0:H, :].reshape(BH, WC), x),
                     xpm_ref[:, 2:2 + H, :].reshape(BH, WC))
    mp = jnp.maximum(jnp.maximum(wshift(mh, -1, NEG_INF), mh),
                     wshift(mh, 1, NEG_INF))

    ah = (xp0_ref[:, 1:1 + H, :].reshape(BH, WC) + x
          + xp0_ref[:, 3:3 + H, :].reshape(BH, WC))
    ap = (wshift(ah, -1, 0.0) + ah + wshift(ah, 1, 0.0)) * (1.0 / 9.0)

    # -- folded BN + architecture-weighted sum -------------------------------
    # op order: 0=Zero, 1=MaxPool+BN, 2=AvgPool+BN, 3=Conv3x3+BN,
    #           4=Conv5x5+BN, 5=Identity (Zero contributes nothing)
    scales, shifts = bn_scale_shift([mp, ap, c3, c5])        # (4, WC) each
    w_mp = opw_ref[e, 1]
    w_ap = opw_ref[e, 2]
    w_c3 = opw_ref[e, 3]
    w_c5 = opw_ref[e, 4]
    w_id = opw_ref[e, 5]

    shift_tot = (w_mp * shifts[0:1] + w_ap * shifts[1:2]
                 + w_c3 * shifts[2:3] + w_c5 * shifts[3:4])
    out_val = (mp * (w_mp * scales[0:1]) + ap * (w_ap * scales[1:2])
               + c3 * (w_c3 * scales[2:3]) + c5 * (w_c5 * scales[3:4])
               + w_id * x + shift_tot)

    # -- routing: accumulate into intermediate node OR write output slab ----
    @pl.when(jnp.logical_and(is_final == 0, is_first == 1))
    def _write_new():
        feats_ref[dst] = out_val

    @pl.when(jnp.logical_and(is_final == 0, is_first == 0))
    def _accumulate():
        feats_ref[dst] = feats_ref[dst] + out_val

    @pl.when(is_final == 1)
    def _write_out():
        out_ref[slot] = out_val


# ---------------------------------------------------------------------------
# Wrapper
# ---------------------------------------------------------------------------
def init_params(key, in_channels, channels, num_edges):
    k1, k2, k3 = jax.random.split(key, 3)
    return {
        # 1x1 conv weight stored as (Cin, Cout)
        "chn_fix_w": 0.1 * jax.random.normal(
            k1, (in_channels, channels), jnp.float32),
        # per-edge conv weights stored as (edge, kh, kw, Cin, Cout)
        "w3": 0.1 * jax.random.normal(
            k2, (num_edges, 3, 3, channels, channels), jnp.float32),
        "w5": 0.1 * jax.random.normal(
            k3, (num_edges, 5, 5, channels, channels), jnp.float32),
    }


def search_normal_cell_forward(x_nchw, alphas, params, cell_nodes):
    starts, ends = generate_nodes(cell_nodes)
    num_edges = len(starts)
    last = cell_nodes - 1
    e_last = sum(1 for t in ends if t == last)
    n_src = cell_nodes - 1

    B, Cin, H, W = x_nchw.shape
    C = params["chn_fix_w"].shape[1]
    BH, WC = B * H, W * C

    # NCHW -> lane-dense (B*H, W*Cin) once at the boundary.
    x_in = jnp.transpose(x_nchw, (0, 2, 3, 1)).reshape(BH, W * Cin)

    # Hoisted out of the kernel: architecture softmax + repacked weights.
    opw = jax.nn.softmax(alphas.astype(jnp.float32), axis=-1)    # (E, NUM_OPS)
    wband = build_banded_conv_weights(params["w3"], params["w5"], W)
    wfix_band = build_block_diag_1x1(params["chn_fix_w"], W).astype(jnp.bfloat16)

    # Per-channel gather/scatter matrices for the (w, c)-interleaved lane dim.
    sel = jnp.tile(jnp.eye(C, dtype=jnp.float32), (W, 1))        # (WC, C)
    selt = jnp.transpose(sel)                                    # (C, WC)

    meta = jnp.asarray(build_edge_meta(starts, ends, cell_nodes))

    kernel = functools.partial(_cell_kernel, B=B, H=H, W=W, C=C)

    grid_spec = pltpu.PrefetchScalarGridSpec(
        num_scalar_prefetch=1,           # meta: per-edge routing table (SMEM)
        grid=(num_edges,),
        in_specs=[
            pl.BlockSpec((BH, W * Cin), lambda e, m: (0, 0)),          # x_in
            pl.BlockSpec((W * Cin, WC), lambda e, m: (0, 0)),          # 1x1 band
            pl.BlockSpec((WC, C), lambda e, m: (0, 0)),                # sel
            pl.BlockSpec((C, WC), lambda e, m: (0, 0)),                # selT
            pl.BlockSpec(memory_space=pltpu.MemorySpace.SMEM),         # opw
            pl.BlockSpec((1, 5, WC, 2 * WC), lambda e, m: (e, 0, 0, 0)),  # conv bands
        ],
        out_specs=pl.BlockSpec((e_last, BH, WC), lambda e, m: (0, 0, 0)),
        scratch_shapes=[
            pltpu.VMEM((n_src, BH, WC), jnp.float32),       # node features
            pltpu.VMEM((B, H + 4, WC), jnp.float32),        # zero H-pad (conv/avg)
            pltpu.VMEM((B, H + 2, WC), jnp.float32),        # -inf H-pad (max)
        ],
    )
    out_k = pl.pallas_call(
        kernel,
        grid_spec=grid_spec,
        out_shape=jax.ShapeDtypeStruct((e_last, BH, WC), jnp.float32),
        compiler_params=pltpu.CompilerParams(
            dimension_semantics=("arbitrary",),      # edges are sequential (DAG deps)
            vmem_limit_bytes=32 * 1024 * 1024,
        ),
    )(meta, x_in, wfix_band, sel, selt, opw, wband)

    # (E_last, B*H, W*C) -> (B, E_last*C, H, W): torch.cat(dim=1) over the
    # final node's per-edge NCHW outputs, in edge order.
    out = out_k.reshape(e_last, B, H, W, C)
    out = jnp.transpose(out, (1, 0, 4, 2, 3)).reshape(B, e_last * C, H, W)
    return out


if __name__ == "__main__":
    B, Cin, C, H, W = 2, 3, 8, 16, 16
    CELL_NODES = 4
    starts, ends = generate_nodes(CELL_NODES)
    E = len(starts)   # 6 edges for 4 nodes

    key = jax.random.PRNGKey(0)
    kx, ka, kp = jax.random.split(key, 3)
    x = jax.random.normal(kx, (B, Cin, H, W), jnp.float32)      # NCHW input
    alphas = 1e-3 * jax.random.normal(ka, (E, NUM_OPS), jnp.float32)
    params = init_params(kp, Cin, C, E)

    fwd = jax.jit(search_normal_cell_forward, static_argnums=(3,))
    out = fwd(x, alphas, params, CELL_NODES)
    out = jax.block_until_ready(out)
    assert out.shape == (B, (CELL_NODES - 1) * C, H, W), out.shape
    assert bool(jnp.all(jnp.isfinite(out)))
    print("KERNEL_OK")
</pallas_src>

<mosaic_0001>
module attributes {stable_mosaic.version = 11 : i64} {
  func.func @_cell_kernel(%arg0: i32, %arg1: memref<6x5xi32, #tpu.memory_space<smem>>, %arg2: memref<32x48xf32, #tpu.memory_space<vmem>>, %arg3: memref<48x128xbf16, #tpu.memory_space<vmem>>, %arg4: memref<128x8xf32, #tpu.memory_space<vmem>>, %arg5: memref<8x128xf32, #tpu.memory_space<vmem>>, %arg6: memref<6x6xf32, #tpu.memory_space<smem>>, %arg7: memref<1x5x128x256xbf16, #tpu.memory_space<vmem>>, %arg8: memref<3x32x128xf32, #tpu.memory_space<vmem>>, %arg9: memref<3x32x128xf32, #tpu.memory_space<vmem>>, %arg10: memref<2x20x128xf32, #tpu.memory_space<vmem>>, %arg11: memref<2x18x128xf32, #tpu.memory_space<vmem>>) attributes {dimension_semantics = [#tpu.dimension_semantics<arbitrary>], iteration_bounds = array<i64: 6>, scalar_prefetch = 1 : i64, scratch_operands = 3 : i64, tpu.core_type = #tpu.core_type<tc>, window_params = [{pipeline_mode = #tpu.pipeline_mode<synchronous>, transform_indices = @transform_0, window_bounds = array<i64: 32, 48>}, {pipeline_mode = #tpu.pipeline_mode<synchronous>, transform_indices = @transform_1, window_bounds = array<i64: 48, 128>}, {pipeline_mode = #tpu.pipeline_mode<synchronous>, transform_indices = @transform_2, window_bounds = array<i64: 128, 8>}, {pipeline_mode = #tpu.pipeline_mode<synchronous>, transform_indices = @transform_3, window_bounds = array<i64: 8, 128>}, {transform_indices = @transform_4, window_bounds = array<i64: 6, 6>}, {transform_indices = @transform_5, window_bounds = array<i64: 1, 5, 128, 256>}, {pipeline_mode = #tpu.pipeline_mode<synchronous>, transform_indices = @transform_6, window_bounds = array<i64: 3, 32, 128>}]} {
    %c0_i32 = arith.constant 0 : i32
    %0 = arith.cmpi eq, %arg0, %c0_i32 : i32
    %1 = arith.extui %0 : i1 to i32
    %c0_i32_0 = arith.constant 0 : i32
    %2 = arith.cmpi ne, %1, %c0_i32_0 : i32
    scf.if %2 {
      %cst_94 = arith.constant 0.000000e+00 : f32
      %193 = vector.broadcast %cst_94 : f32 to vector<2x20x128xf32>
      %c0_95 = arith.constant 0 : index
      %c0_96 = arith.constant 0 : index
      %c0_97 = arith.constant 0 : index
      %194 = vector.load %arg10[%c0_95, %c0_96, %c0_97] : memref<2x20x128xf32, #tpu.memory_space<vmem>>, vector<2x20x128xf32>
      tpu.vector_store %arg10[%c0_95, %c0_96, %c0_97], %193 {strides = array<i32>} : memref<2x20x128xf32, #tpu.memory_space<vmem>>, vector<2x20x128xf32>,
      %cst_98 = arith.constant -1.000000e+30 : f32
      %195 = vector.broadcast %cst_98 : f32 to vector<2x18x128xf32>
      %c0_99 = arith.constant 0 : index
      %c0_100 = arith.constant 0 : index
      %c0_101 = arith.constant 0 : index
      %196 = vector.load %arg11[%c0_99, %c0_100, %c0_101] : memref<2x18x128xf32, #tpu.memory_space<vmem>>, vector<2x18x128xf32>
      tpu.vector_store %arg11[%c0_99, %c0_100, %c0_101], %195 {strides = array<i32>} : memref<2x18x128xf32, #tpu.memory_space<vmem>>, vector<2x18x128xf32>,
      %c0_102 = arith.constant 0 : index
      %c0_103 = arith.constant 0 : index
      %197 = vector.load %arg2[%c0_102, %c0_103] : memref<32x48xf32, #tpu.memory_space<vmem>>, vector<32x48xf32>
      %198 = arith.truncf %197 : vector<32x48xf32> to vector<32x48xbf16>
      %c0_104 = arith.constant 0 : index
      %c0_105 = arith.constant 0 : index
      %199 = vector.load %arg3[%c0_104, %c0_105] : memref<48x128xbf16, #tpu.memory_space<vmem>>, vector<48x128xbf16>
      %cst_106 = arith.constant dense<0.000000e+00> : vector<32x128xf32>
      %200 = tpu.matmul %198, %199, %cst_106 {dimension_numbers = #tpu.dot_dimension_numbers<[1], [0], [0], [1], [0, 0, 1, 1], [], []>} : vector<32x48xbf16>, vector<48x128xbf16>, vector<32x128xf32> -> vector<32x128xf32>
      %cst_107 = arith.constant dense<0.000000e+00> : vector<128xf32>
      %201 = vector.multi_reduction <add>, %200, %cst_107 [0] : vector<32x128xf32> to vector<128xf32>
      %202 = vector.shape_cast %201 : vector<128xf32> to vector<1x128xf32>
      %203 = arith.mulf %200, %200 : vector<32x128xf32>
      %cst_108 = arith.constant dense<0.000000e+00> : vector<128xf32>
      %204 = vector.multi_reduction <add>, %203, %cst_108 [0] : vector<32x128xf32> to vector<128xf32>
      %205 = vector.shape_cast %204 : vector<128xf32> to vector<1x128xf32>
      %206 = tpu.concatenate %202, %205 in 0 : vector<1x128xf32>, vector<1x128xf32> -> vector<2x128xf32>
      %cst_109 = arith.constant 0.000000e+00 : f32
      %207 = vector.broadcast %cst_109 : f32 to vector<6x128xf32>
      %208 = tpu.concatenate %206, %207 in 0 : vector<2x128xf32>, vector<6x128xf32> -> vector<8x128xf32>
      %c0_110 = arith.constant 0 : index
      %c0_111 = arith.constant 0 : index
      %209 = vector.load %arg4[%c0_110, %c0_111] : memref<128x8xf32, #tpu.memory_space<vmem>>, vector<128x8xf32>
      %cst_112 = arith.constant dense<0.000000e+00> : vector<8x8xf32>
      %210 = tpu.matmul %208, %209, %cst_112 {dimension_numbers = #tpu.dot_dimension_numbers<[1], [0], [0], [1], [0, 0, 1, 1], [], []>} : vector<8x128xf32>, vector<128x8xf32>, vector<8x8xf32> -> vector<8x8xf32>
      %cst_113 = arith.constant 0.001953125 : f32
      %211 = vector.broadcast %cst_113 : f32 to vector<8x8xf32>
      %212 = arith.mulf %210, %211 : vector<8x8xf32>
      %213 = vector.extract_strided_slice %212 {offsets = [0, 0], sizes = [1, 8], strides = [1, 1]} : vector<8x8xf32> to vector<1x8xf32>
      %214 = vector.extract_strided_slice %212 {offsets = [1, 0], sizes = [1, 8], strides = [1, 1]} : vector<8x8xf32> to vector<1x8xf32>
      %215 = arith.mulf %213, %213 : vector<1x8xf32>
      %216 = arith.subf %214, %215 : vector<1x8xf32>
      %cst_114 = arith.constant 0.000000e+00 : f32
      %217 = vector.broadcast %cst_114 : f32 to vector<1x8xf32>
      %218 = arith.maximumf %216, %217 : vector<1x8xf32>
      %cst_115 = arith.constant 9.99999974E-6 : f32
      %219 = vector.broadcast %cst_115 : f32 to vector<1x8xf32>
      %220 = arith.addf %218, %219 : vector<1x8xf32>
      %221 = math.rsqrt %220 : vector<1x8xf32>
      %cst_116 = arith.constant 0.000000e+00 : f32
      %222 = vector.broadcast %cst_116 : f32 to vector<1x8xf32>
      %223 = arith.subf %222, %213 : vector<1x8xf32>
      %224 = arith.mulf %223, %221 : vector<1x8xf32>
      %225 = tpu.concatenate %221, %224 in 0 : vector<1x8xf32>, vector<1x8xf32> -> vector<2x8xf32>
      %cst_117 = arith.constant 0.000000e+00 : f32
      %226 = vector.broadcast %cst_117 : f32 to vector<6x8xf32>
      %227 = tpu.concatenate %225, %226 in 0 : vector<2x8xf32>, vector<6x8xf32> -> vector<8x8xf32>
      %c0_118 = arith.constant 0 : index
      %c0_119 = arith.constant 0 : index
      %228 = vector.load %arg5[%c0_118, %c0_119] : memref<8x128xf32, #tpu.memory_space<vmem>>, vector<8x128xf32>
      %cst_120 = arith.constant dense<0.000000e+00> : vector<8x128xf32>
      %229 = tpu.matmul %227, %228, %cst_120 {dimension_numbers = #tpu.dot_dimension_numbers<[1], [0], [0], [1], [0, 0, 1, 1], [], []>} : vector<8x8xf32>, vector<8x128xf32>, vector<8x128xf32> -> vector<8x128xf32>
      %230 = vector.extract_strided_slice %229 {offsets = [0, 0], sizes = [1, 128], strides = [1, 1]} : vector<8x128xf32> to vector<1x128xf32>
      %231 = vector.extract_strided_slice %229 {offsets = [1, 0], sizes = [1, 128], strides = [1, 1]} : vector<8x128xf32> to vector<1x128xf32>
      %232 = vector.broadcast %230 : vector<1x128xf32> to vector<32x128xf32>
      %233 = arith.mulf %200, %232 : vector<32x128xf32>
      %234 = vector.broadcast %231 : vector<1x128xf32> to vector<32x128xf32>
      %235 = arith.addf %233, %234 : vector<32x128xf32>
      %c0_121 = arith.constant 0 : index
      %c0_122 = arith.constant 0 : index
      %c0_123 = arith.constant 0 : index
      %236 = vector.load %arg9[%c0_121, %c0_122, %c0_123] : memref<3x32x128xf32, #tpu.memory_space<vmem>>, vector<1x32x128xf32>
      %237 = vector.shape_cast %236 : vector<1x32x128xf32> to vector<32x128xf32>
      %238 = vector.shape_cast %235 : vector<32x128xf32> to vector<1x32x128xf32>
      tpu.vector_store %arg9[%c0_121, %c0_122, %c0_123], %238 {strides = array<i32>} : memref<3x32x128xf32, #tpu.memory_space<vmem>>, vector<1x32x128xf32>,
    } else {
    }
    %3 = arith.index_cast %arg0 : i32 to index
    %c0 = arith.constant 0 : index
    %4 = memref.load %arg1[%3, %c0] : memref<6x5xi32, #tpu.memory_space<smem>>
    %5 = arith.index_cast %arg0 : i32 to index
    %c1 = arith.constant 1 : index
    %6 = memref.load %arg1[%5, %c1] : memref<6x5xi32, #tpu.memory_space<smem>>
    %7 = arith.index_cast %arg0 : i32 to index
    %c2 = arith.constant 2 : index
    %8 = memref.load %arg1[%7, %c2] : memref<6x5xi32, #tpu.memory_space<smem>>
    %9 = arith.index_cast %arg0 : i32 to index
    %c3 = arith.constant 3 : index
    %10 = memref.load %arg1[%9, %c3] : memref<6x5xi32, #tpu.memory_space<smem>>
    %11 = arith.index_cast %arg0 : i32 to index
    %c4 = arith.constant 4 : index
    %12 = memref.load %arg1[%11, %c4] : memref<6x5xi32, #tpu.memory_space<smem>>
    %13 = arith.index_cast %4 : i32 to index
    %c0_1 = arith.constant 0 : index
    %c0_2 = arith.constant 0 : index
    %14 = vector.load %arg9[%13, %c0_1, %c0_2] : memref<3x32x128xf32, #tpu.memory_space<vmem>>, vector<1x32x128xf32>
    %15 = vector.shape_cast %14 : vector<1x32x128xf32> to vector<32x128xf32>
    %16 = vector.shape_cast %15 : vector<32x128xf32> to vector<2x16x128xf32>
    %c0_3 = arith.constant 0 : index
    %c2_4 = arith.constant 2 : index
    %c0_5 = arith.constant 0 : index
    %17 = vector.load %arg10[%c0_3, %c2_4, %c0_5] : memref<2x20x128xf32, #tpu.memory_space<vmem>>, vector<2x16x128xf32>
    tpu.vector_store %arg10[%c0_3, %c2_4, %c0_5], %16 {strides = array<i32>} : memref<2x20x128xf32, #tpu.memory_space<vmem>>, vector<2x16x128xf32>,
    %c0_6 = arith.constant 0 : index
    %c1_7 = arith.constant 1 : index
    %c0_8 = arith.constant 0 : index
    %18 = vector.load %arg11[%c0_6, %c1_7, %c0_8] : memref<2x18x128xf32, #tpu.memory_space<vmem>>, vector<2x16x128xf32>
    tpu.vector_store %arg11[%c0_6, %c1_7, %c0_8], %16 {strides = array<i32>} : memref<2x18x128xf32, #tpu.memory_space<vmem>>, vector<2x16x128xf32>,
    %c0_9 = arith.constant 0 : index
    %c0_10 = arith.constant 0 : index
    %c0_11 = arith.constant 0 : index
    %19 = vector.load %arg10[%c0_9, %c0_10, %c0_11] : memref<2x20x128xf32, #tpu.memory_space<vmem>>, vector<2x16x128xf32>
    %20 = vector.shape_cast %19 : vector<2x16x128xf32> to vector<32x128xf32>
    %21 = arith.truncf %20 : vector<32x128xf32> to vector<32x128xbf16>
    %c0_12 = arith.constant 0 : index
    %c0_13 = arith.constant 0 : index
    %c0_14 = arith.constant 0 : index
    %c0_15 = arith.constant 0 : index
    %22 = vector.load %arg7[%c0_12, %c0_13, %c0_14, %c0_15] : memref<1x5x128x256xbf16, #tpu.memory_space<vmem>>, vector<1x1x128x256xbf16>
    %23 = vector.shape_cast %22 : vector<1x1x128x256xbf16> to vector<128x256xbf16>
    %cst = arith.constant dense<0.000000e+00> : vector<32x256xf32>
    %24 = tpu.matmul %21, %23, %cst {dimension_numbers = #tpu.dot_dimension_numbers<[1], [0], [0], [1], [0, 0, 1, 1], [], []>} : vector<32x128xbf16>, vector<128x256xbf16>, vector<32x256xf32> -> vector<32x256xf32>
    %c0_16 = arith.constant 0 : index
    %c1_17 = arith.constant 1 : index
    %c0_18 = arith.constant 0 : index
    %25 = vector.load %arg10[%c0_16, %c1_17, %c0_18] : memref<2x20x128xf32, #tpu.memory_space<vmem>>, vector<2x16x128xf32>
    %26 = vector.shape_cast %25 : vector<2x16x128xf32> to vector<32x128xf32>
    %27 = arith.truncf %26 : vector<32x128xf32> to vector<32x128xbf16>
    %c0_19 = arith.constant 0 : index
    %c1_20 = arith.constant 1 : index
    %c0_21 = arith.constant 0 : index
    %c0_22 = arith.constant 0 : index
    %28 = vector.load %arg7[%c0_19, %c1_20, %c0_21, %c0_22] : memref<1x5x128x256xbf16, #tpu.memory_space<vmem>>, vector<1x1x128x256xbf16>
    %29 = vector.shape_cast %28 : vector<1x1x128x256xbf16> to vector<128x256xbf16>
    %cst_23 = arith.constant dense<0.000000e+00> : vector<32x256xf32>
    %30 = tpu.matmul %27, %29, %cst_23 {dimension_numbers = #tpu.dot_dimension_numbers<[1], [0], [0], [1], [0, 0, 1, 1], [], []>} : vector<32x128xbf16>, vector<128x256xbf16>, vector<32x256xf32> -> vector<32x256xf32>
    %31 = arith.addf %24, %30 : vector<32x256xf32>
    %c0_24 = arith.constant 0 : index
    %c2_25 = arith.constant 2 : index
    %c0_26 = arith.constant 0 : index
    %32 = vector.load %arg10[%c0_24, %c2_25, %c0_26] : memref<2x20x128xf32, #tpu.memory_space<vmem>>, vector<2x16x128xf32>
    %33 = vector.shape_cast %32 : vector<2x16x128xf32> to vector<32x128xf32>
    %34 = arith.truncf %33 : vector<32x128xf32> to vector<32x128xbf16>
    %c0_27 = arith.constant 0 : index
    %c2_28 = arith.constant 2 : index
    %c0_29 = arith.constant 0 : index
    %c0_30 = arith.constant 0 : index
    %35 = vector.load %arg7[%c0_27, %c2_28, %c0_29, %c0_30] : memref<1x5x128x256xbf16, #tpu.memory_space<vmem>>, vector<1x1x128x256xbf16>
    %36 = vector.shape_cast %35 : vector<1x1x128x256xbf16> to vector<128x256xbf16>
    %cst_31 = arith.constant dense<0.000000e+00> : vector<32x256xf32>
    %37 = tpu.matmul %34, %36, %cst_31 {dimension_numbers = #tpu.dot_dimension_numbers<[1], [0], [0], [1], [0, 0, 1, 1], [], []>} : vector<32x128xbf16>, vector<128x256xbf16>, vector<32x256xf32> -> vector<32x256xf32>
    %38 = arith.addf %31, %37 : vector<32x256xf32>
    %c0_32 = arith.constant 0 : index
    %c3_33 = arith.constant 3 : index
    %c0_34 = arith.constant 0 : index
    %39 = vector.load %arg10[%c0_32, %c3_33, %c0_34] : memref<2x20x128xf32, #tpu.memory_space<vmem>>, vector<2x16x128xf32>
    %40 = vector.shape_cast %39 : vector<2x16x128xf32> to vector<32x128xf32>
    %41 = arith.truncf %40 : vector<32x128xf32> to vector<32x128xbf16>
    %c0_35 = arith.constant 0 : index
    %c3_36 = arith.constant 3 : index
    %c0_37 = arith.constant 0 : index
    %c0_38 = arith.constant 0 : index
    %42 = vector.load %arg7[%c0_35, %c3_36, %c0_37, %c0_38] : memref<1x5x128x256xbf16, #tpu.memory_space<vmem>>, vector<1x1x128x256xbf16>
    %43 = vector.shape_cast %42 : vector<1x1x128x256xbf16> to vector<128x256xbf16>
    %cst_39 = arith.constant dense<0.000000e+00> : vector<32x256xf32>
    %44 = tpu.matmul %41, %43, %cst_39 {dimension_numbers = #tpu.dot_dimension_numbers<[1], [0], [0], [1], [0, 0, 1, 1], [], []>} : vector<32x128xbf16>, vector<128x256xbf16>, vector<32x256xf32> -> vector<32x256xf32>
    %45 = arith.addf %38, %44 : vector<32x256xf32>
    %c0_40 = arith.constant 0 : index
    %c4_41 = arith.constant 4 : index
    %c0_42 = arith.constant 0 : index
    %46 = vector.load %arg10[%c0_40, %c4_41, %c0_42] : memref<2x20x128xf32, #tpu.memory_space<vmem>>, vector<2x16x128xf32>
    %47 = vector.shape_cast %46 : vector<2x16x128xf32> to vector<32x128xf32>
    %48 = arith.truncf %47 : vector<32x128xf32> to vector<32x128xbf16>
    %c0_43 = arith.constant 0 : index
    %c4_44 = arith.constant 4 : index
    %c0_45 = arith.constant 0 : index
    %c0_46 = arith.constant 0 : index
    %49 = vector.load %arg7[%c0_43, %c4_44, %c0_45, %c0_46] : memref<1x5x128x256xbf16, #tpu.memory_space<vmem>>, vector<1x1x128x256xbf16>
    %50 = vector.shape_cast %49 : vector<1x1x128x256xbf16> to vector<128x256xbf16>
    %cst_47 = arith.constant dense<0.000000e+00> : vector<32x256xf32>
    %51 = tpu.matmul %48, %50, %cst_47 {dimension_numbers = #tpu.dot_dimension_numbers<[1], [0], [0], [1], [0, 0, 1, 1], [], []>} : vector<32x128xbf16>, vector<128x256xbf16>, vector<32x256xf32> -> vector<32x256xf32>
    %52 = arith.addf %45, %51 : vector<32x256xf32>
    %53 = vector.extract_strided_slice %52 {offsets = [0, 0], sizes = [32, 128], strides = [1, 1]} : vector<32x256xf32> to vector<32x128xf32>
    %54 = vector.extract_strided_slice %52 {offsets = [0, 128], sizes = [32, 128], strides = [1, 1]} : vector<32x256xf32> to vector<32x128xf32>
    %c0_48 = arith.constant 0 : index
    %c0_49 = arith.constant 0 : index
    %c0_50 = arith.constant 0 : index
    %55 = vector.load %arg11[%c0_48, %c0_49, %c0_50] : memref<2x18x128xf32, #tpu.memory_space<vmem>>, vector<2x16x128xf32>
    %56 = vector.shape_cast %55 : vector<2x16x128xf32> to vector<32x128xf32>
    %57 = arith.maximumf %56, %15 : vector<32x128xf32>
    %c0_51 = arith.constant 0 : index
    %c2_52 = arith.constant 2 : index
    %c0_53 = arith.constant 0 : index
    %58 = vector.load %arg11[%c0_51, %c2_52, %c0_53] : memref<2x18x128xf32, #tpu.memory_space<vmem>>, vector<2x16x128xf32>
    %59 = vector.shape_cast %58 : vector<2x16x128xf32> to vector<32x128xf32>
    %60 = arith.maximumf %57, %59 : vector<32x128xf32>
    %cst_54 = arith.constant -1.000000e+30 : f32
    %61 = vector.broadcast %cst_54 : f32 to vector<32x8xf32>
    %62 = vector.extract_strided_slice %60 {offsets = [0, 0], sizes = [32, 120], strides = [1, 1]} : vector<32x128xf32> to vector<32x120xf32>
    %63 = tpu.concatenate %61, %62 in 1 : vector<32x8xf32>, vector<32x120xf32> -> vector<32x128xf32>
    %64 = arith.maximumf %63, %60 : vector<32x128xf32>
    %cst_55 = arith.constant -1.000000e+30 : f32
    %65 = vector.broadcast %cst_55 : f32 to vector<32x8xf32>
    %66 = vector.extract_strided_slice %60 {offsets = [0, 8], sizes = [32, 120], strides = [1, 1]} : vector<32x128xf32> to vector<32x120xf32>
    %67 = tpu.concatenate %66, %65 in 1 : vector<32x120xf32>, vector<32x8xf32> -> vector<32x128xf32>
    %68 = arith.maximumf %64, %67 : vector<32x128xf32>
    %c0_56 = arith.constant 0 : index
    %c1_57 = arith.constant 1 : index
    %c0_58 = arith.constant 0 : index
    %69 = vector.load %arg10[%c0_56, %c1_57, %c0_58] : memref<2x20x128xf32, #tpu.memory_space<vmem>>, vector<2x16x128xf32>
    %70 = vector.shape_cast %69 : vector<2x16x128xf32> to vector<32x128xf32>
    %71 = arith.addf %70, %15 : vector<32x128xf32>
    %c0_59 = arith.constant 0 : index
    %c3_60 = arith.constant 3 : index
    %c0_61 = arith.constant 0 : index
    %72 = vector.load %arg10[%c0_59, %c3_60, %c0_61] : memref<2x20x128xf32, #tpu.memory_space<vmem>>, vector<2x16x128xf32>
    %73 = vector.shape_cast %72 : vector<2x16x128xf32> to vector<32x128xf32>
    %74 = arith.addf %71, %73 : vector<32x128xf32>
    %cst_62 = arith.constant 0.000000e+00 : f32
    %75 = vector.broadcast %cst_62 : f32 to vector<32x8xf32>
    %76 = vector.extract_strided_slice %74 {offsets = [0, 0], sizes = [32, 120], strides = [1, 1]} : vector<32x128xf32> to vector<32x120xf32>
    %77 = tpu.concatenate %75, %76 in 1 : vector<32x8xf32>, vector<32x120xf32> -> vector<32x128xf32>
    %78 = arith.addf %77, %74 : vector<32x128xf32>
    %cst_63 = arith.constant 0.000000e+00 : f32
    %79 = vector.broadcast %cst_63 : f32 to vector<32x8xf32>
    %80 = vector.extract_strided_slice %74 {offsets = [0, 8], sizes = [32, 120], strides = [1, 1]} : vector<32x128xf32> to vector<32x120xf32>
    %81 = tpu.concatenate %80, %79 in 1 : vector<32x120xf32>, vector<32x8xf32> -> vector<32x128xf32>
    %82 = arith.addf %78, %81 : vector<32x128xf32>
    %cst_64 = arith.constant 0.111111112 : f32
    %83 = vector.broadcast %cst_64 : f32 to vector<32x128xf32>
    %84 = arith.mulf %82, %83 : vector<32x128xf32>
    %cst_65 = arith.constant dense<0.000000e+00> : vector<128xf32>
    %85 = vector.multi_reduction <add>, %68, %cst_65 [0] : vector<32x128xf32> to vector<128xf32>
    %86 = vector.shape_cast %85 : vector<128xf32> to vector<1x128xf32>
    %cst_66 = arith.constant dense<0.000000e+00> : vector<128xf32>
    %87 = vector.multi_reduction <add>, %84, %cst_66 [0] : vector<32x128xf32> to vector<128xf32>
    %88 = vector.shape_cast %87 : vector<128xf32> to vector<1x128xf32>
    %cst_67 = arith.constant dense<0.000000e+00> : vector<128xf32>
    %89 = vector.multi_reduction <add>, %53, %cst_67 [0] : vector<32x128xf32> to vector<128xf32>
    %90 = vector.shape_cast %89 : vector<128xf32> to vector<1x128xf32>
    %cst_68 = arith.constant dense<0.000000e+00> : vector<128xf32>
    %91 = vector.multi_reduction <add>, %54, %cst_68 [0] : vector<32x128xf32> to vector<128xf32>
    %92 = vector.shape_cast %91 : vector<128xf32> to vector<1x128xf32>
    %93 = arith.mulf %68, %68 : vector<32x128xf32>
    %cst_69 = arith.constant dense<0.000000e+00> : vector<128xf32>
    %94 = vector.multi_reduction <add>, %93, %cst_69 [0] : vector<32x128xf32> to vector<128xf32>
    %95 = vector.shape_cast %94 : vector<128xf32> to vector<1x128xf32>
    %96 = arith.mulf %84, %84 : vector<32x128xf32>
    %cst_70 = arith.constant dense<0.000000e+00> : vector<128xf32>
    %97 = vector.multi_reduction <add>, %96, %cst_70 [0] : vector<32x128xf32> to vector<128xf32>
    %98 = vector.shape_cast %97 : vector<128xf32> to vector<1x128xf32>
    %99 = arith.mulf %53, %53 : vector<32x128xf32>
    %cst_71 = arith.constant dense<0.000000e+00> : vector<128xf32>
    %100 = vector.multi_reduction <add>, %99, %cst_71 [0] : vector<32x128xf32> to vector<128xf32>
    %101 = vector.shape_cast %100 : vector<128xf32> to vector<1x128xf32>
    %102 = arith.mulf %54, %54 : vector<32x128xf32>
    %cst_72 = arith.constant dense<0.000000e+00> : vector<128xf32>
    %103 = vector.multi_reduction <add>, %102, %cst_72 [0] : vector<32x128xf32> to vector<128xf32>
    %104 = vector.shape_cast %103 : vector<128xf32> to vector<1x128xf32>
    %105 = tpu.concatenate %86, %88, %90, %92, %95, %98, %101, %104 in 0 : vector<1x128xf32>, vector<1x128xf32>, vector<1x128xf32>, vector<1x128xf32>, vector<1x128xf32>, vector<1x128xf32>, vector<1x128xf32>, vector<1x128xf32> -> vector<8x128xf32>
    %c0_73 = arith.constant 0 : index
    %c0_74 = arith.constant 0 : index
    %106 = vector.load %arg4[%c0_73, %c0_74] : memref<128x8xf32, #tpu.memory_space<vmem>>, vector<128x8xf32>
    %cst_75 = arith.constant dense<0.000000e+00> : vector<8x8xf32>
    %107 = tpu.matmul %105, %106, %cst_75 {dimension_numbers = #tpu.dot_dimension_numbers<[1], [0], [0], [1], [0, 0, 1, 1], [], []>} : vector<8x128xf32>, vector<128x8xf32>, vector<8x8xf32> -> vector<8x8xf32>
    %cst_76 = arith.constant 0.001953125 : f32
    %108 = vector.broadcast %cst_76 : f32 to vector<8x8xf32>
    %109 = arith.mulf %107, %108 : vector<8x8xf32>
    %110 = vector.extract_strided_slice %109 {offsets = [0, 0], sizes = [4, 8], strides = [1, 1]} : vector<8x8xf32> to vector<4x8xf32>
    %111 = vector.extract_strided_slice %109 {offsets = [4, 0], sizes = [4, 8], strides = [1, 1]} : vector<8x8xf32> to vector<4x8xf32>
    %112 = arith.mulf %110, %110 : vector<4x8xf32>
    %113 = arith.subf %111, %112 : vector<4x8xf32>
    %cst_77 = arith.constant 0.000000e+00 : f32
    %114 = vector.broadcast %cst_77 : f32 to vector<4x8xf32>
    %115 = arith.maximumf %113, %114 : vector<4x8xf32>
    %cst_78 = arith.constant 9.99999974E-6 : f32
    %116 = vector.broadcast %cst_78 : f32 to vector<4x8xf32>
    %117 = arith.addf %115, %116 : vector<4x8xf32>
    %118 = math.rsqrt %117 : vector<4x8xf32>
    %cst_79 = arith.constant 0.000000e+00 : f32
    %119 = vector.broadcast %cst_79 : f32 to vector<4x8xf32>
    %120 = arith.subf %119, %110 : vector<4x8xf32>
    %121 = arith.mulf %120, %118 : vector<4x8xf32>
    %122 = tpu.concatenate %118, %121 in 0 : vector<4x8xf32>, vector<4x8xf32> -> vector<8x8xf32>
    %c0_80 = arith.constant 0 : index
    %c0_81 = arith.constant 0 : index
    %123 = vector.load %arg5[%c0_80, %c0_81] : memref<8x128xf32, #tpu.memory_space<vmem>>, vector<8x128xf32>
    %cst_82 = arith.constant dense<0.000000e+00> : vector<8x128xf32>
    %124 = tpu.matmul %122, %123, %cst_82 {dimension_numbers = #tpu.dot_dimension_numbers<[1], [0], [0], [1], [0, 0, 1, 1], [], []>} : vector<8x8xf32>, vector<8x128xf32>, vector<8x128xf32> -> vector<8x128xf32>
    %125 = vector.extract_strided_slice %124 {offsets = [0, 0], sizes = [4, 128], strides = [1, 1]} : vector<8x128xf32> to vector<4x128xf32>
    %126 = vector.extract_strided_slice %124 {offsets = [4, 0], sizes = [4, 128], strides = [1, 1]} : vector<8x128xf32> to vector<4x128xf32>
    %127 = arith.index_cast %arg0 : i32 to index
    %c1_83 = arith.constant 1 : index
    %128 = memref.load %arg6[%127, %c1_83] : memref<6x6xf32, #tpu.memory_space<smem>>
    %129 = arith.index_cast %arg0 : i32 to index
    %c2_84 = arith.constant 2 : index
    %130 = memref.load %arg6[%129, %c2_84] : memref<6x6xf32, #tpu.memory_space<smem>>
    %131 = arith.index_cast %arg0 : i32 to index
    %c3_85 = arith.constant 3 : index
    %132 = memref.load %arg6[%131, %c3_85] : memref<6x6xf32, #tpu.memory_space<smem>>
    %133 = arith.index_cast %arg0 : i32 to index
    %c4_86 = arith.constant 4 : index
    %134 = memref.load %arg6[%133, %c4_86] : memref<6x6xf32, #tpu.memory_space<smem>>
    %135 = arith.index_cast %arg0 : i32 to index
    %c5 = arith.constant 5 : index
    %136 = memref.load %arg6[%135, %c5] : memref<6x6xf32, #tpu.memory_space<smem>>
    %137 = vector.extract_strided_slice %126 {offsets = [0, 0], sizes = [1, 128], strides = [1, 1]} : vector<4x128xf32> to vector<1x128xf32>
    %138 = vector.broadcast %128 : f32 to vector<1x128xf32>
    %139 = arith.mulf %138, %137 : vector<1x128xf32>
    %140 = vector.extract_strided_slice %126 {offsets = [1, 0], sizes = [1, 128], strides = [1, 1]} : vector<4x128xf32> to vector<1x128xf32>
    %141 = vector.broadcast %130 : f32 to vector<1x128xf32>
    %142 = arith.mulf %141, %140 : vector<1x128xf32>
    %143 = arith.addf %139, %142 : vector<1x128xf32>
    %144 = vector.extract_strided_slice %126 {offsets = [2, 0], sizes = [1, 128], strides = [1, 1]} : vector<4x128xf32> to vector<1x128xf32>
    %145 = vector.broadcast %132 : f32 to vector<1x128xf32>
    %146 = arith.mulf %145, %144 : vector<1x128xf32>
    %147 = arith.addf %143, %146 : vector<1x128xf32>
    %148 = vector.extract_strided_slice %126 {offsets = [3, 0], sizes = [1, 128], strides = [1, 1]} : vector<4x128xf32> to vector<1x128xf32>
    %149 = vector.broadcast %134 : f32 to vector<1x128xf32>
    %150 = arith.mulf %149, %148 : vector<1x128xf32>
    %151 = arith.addf %147, %150 : vector<1x128xf32>
    %152 = vector.extract_strided_slice %125 {offsets = [0, 0], sizes = [1, 128], strides = [1, 1]} : vector<4x128xf32> to vector<1x128xf32>
    %153 = vector.broadcast %128 : f32 to vector<1x128xf32>
    %154 = arith.mulf %153, %152 : vector<1x128xf32>
    %155 = vector.broadcast %154 : vector<1x128xf32> to vector<32x128xf32>
    %156 = arith.mulf %68, %155 : vector<32x128xf32>
    %157 = vector.extract_strided_slice %125 {offsets = [1, 0], sizes = [1, 128], strides = [1, 1]} : vector<4x128xf32> to vector<1x128xf32>
    %158 = vector.broadcast %130 : f32 to vector<1x128xf32>
    %159 = arith.mulf %158, %157 : vector<1x128xf32>
    %160 = vector.broadcast %159 : vector<1x128xf32> to vector<32x128xf32>
    %161 = arith.mulf %84, %160 : vector<32x128xf32>
    %162 = arith.addf %156, %161 : vector<32x128xf32>
    %163 = vector.extract_strided_slice %125 {offsets = [2, 0], sizes = [1, 128], strides = [1, 1]} : vector<4x128xf32> to vector<1x128xf32>
    %164 = vector.broadcast %132 : f32 to vector<1x128xf32>
    %165 = arith.mulf %164, %163 : vector<1x128xf32>
    %166 = vector.broadcast %165 : vector<1x128xf32> to vector<32x128xf32>
    %167 = arith.mulf %53, %166 : vector<32x128xf32>
    %168 = arith.addf %162, %167 : vector<32x128xf32>
    %169 = vector.extract_strided_slice %125 {offsets = [3, 0], sizes = [1, 128], strides = [1, 1]} : vector<4x128xf32> to vector<1x128xf32>
    %170 = vector.broadcast %134 : f32 to vector<1x128xf32>
    %171 = arith.mulf %170, %169 : vector<1x128xf32>
    %172 = vector.broadcast %171 : vector<1x128xf32> to vector<32x128xf32>
    %173 = arith.mulf %54, %172 : vector<32x128xf32>
    %174 = arith.addf %168, %173 : vector<32x128xf32>
    %175 = vector.broadcast %136 : f32 to vector<32x128xf32>
    %176 = arith.mulf %175, %15 : vector<32x128xf32>
    %177 = arith.addf %174, %176 : vector<32x128xf32>
    %178 = vector.broadcast %151 : vector<1x128xf32> to vector<32x128xf32>
    %179 = arith.addf %177, %178 : vector<32x128xf32>
    %c0_i32_87 = arith.constant 0 : i32
    %180 = arith.cmpi eq, %10, %c0_i32_87 : i32
    %c1_i32 = arith.constant 1 : i32
    %181 = arith.cmpi eq, %8, %c1_i32 : i32
    %182 = arith.andi %180, %181 : i1
    %183 = arith.extui %182 : i1 to i32
    %c0_i32_88 = arith.constant 0 : i32
    %184 = arith.cmpi ne, %183, %c0_i32_88 : i32
    scf.if %184 {
      %193 = arith.index_cast %6 : i32 to index
      %c0_94 = arith.constant 0 : index
      %c0_95 = arith.constant 0 : index
      %194 = vector.load %arg9[%193, %c0_94, %c0_95] : memref<3x32x128xf32, #tpu.memory_space<vmem>>, vector<1x32x128xf32>
      %195 = vector.shape_cast %194 : vector<1x32x128xf32> to vector<32x128xf32>
      %196 = vector.shape_cast %179 : vector<32x128xf32> to vector<1x32x128xf32>
      tpu.vector_store %arg9[%193, %c0_94, %c0_95], %196 {strides = array<i32>} : memref<3x32x128xf32, #tpu.memory_space<vmem>>, vector<1x32x128xf32>,
    } else {
    }
    %c0_i32_89 = arith.constant 0 : i32
    %185 = arith.cmpi eq, %10, %c0_i32_89 : i32
    %c0_i32_90 = arith.constant 0 : i32
    %186 = arith.cmpi eq, %8, %c0_i32_90 : i32
    %187 = arith.andi %185, %186 : i1
    %188 = arith.extui %187 : i1 to i32
    %c0_i32_91 = arith.constant 0 : i32
    %189 = arith.cmpi ne, %188, %c0_i32_91 : i32
    scf.if %189 {
      %193 = arith.index_cast %6 : i32 to index
      %c0_94 = arith.constant 0 : index
      %c0_95 = arith.constant 0 : index
      %194 = vector.load %arg9[%193, %c0_94, %c0_95] : memref<3x32x128xf32, #tpu.memory_space<vmem>>, vector<1x32x128xf32>
      %195 = vector.shape_cast %194 : vector<1x32x128xf32> to vector<32x128xf32>
      %196 = arith.addf %195, %179 : vector<32x128xf32>
      %197 = arith.index_cast %6 : i32 to index
      %c0_96 = arith.constant 0 : index
      %c0_97 = arith.constant 0 : index
      %198 = vector.load %arg9[%197, %c0_96, %c0_97] : memref<3x32x128xf32, #tpu.memory_space<vmem>>, vector<1x32x128xf32>
      %199 = vector.shape_cast %198 : vector<1x32x128xf32> to vector<32x128xf32>
      %200 = vector.shape_cast %196 : vector<32x128xf32> to vector<1x32x128xf32>
      tpu.vector_store %arg9[%197, %c0_96, %c0_97], %200 {strides = array<i32>} : memref<3x32x128xf32, #tpu.memory_space<vmem>>, vector<1x32x128xf32>,
    } else {
    }
    %c1_i32_92 = arith.constant 1 : i32
    %190 = arith.cmpi eq, %10, %c1_i32_92 : i32
    %191 = arith.extui %190 : i1 to i32
    %c0_i32_93 = arith.constant 0 : i32
    %192 = arith.cmpi ne, %191, %c0_i32_93 : i32
    scf.if %192 {
      %193 = arith.index_cast %12 : i32 to index
      %c0_94 = arith.constant 0 : index
      %c0_95 = arith.constant 0 : index
      %194 = vector.load %arg8[%193, %c0_94, %c0_95] : memref<3x32x128xf32, #tpu.memory_space<vmem>>, vector<1x32x128xf32>
      %195 = vector.shape_cast %194 : vector<1x32x128xf32> to vector<32x128xf32>
      %196 = vector.shape_cast %179 : vector<32x128xf32> to vector<1x32x128xf32>
      tpu.vector_store %arg8[%193, %c0_94, %c0_95], %196 {strides = array<i32>} : memref<3x32x128xf32, #tpu.memory_space<vmem>>, vector<1x32x128xf32>,
    } else {
    }
    return
  }
  func.func @transform_0(%arg0: i32, %arg1: memref<6x5xi32, #tpu.memory_space<smem>>) -> (i32, i32) {
    %c0_i32 = arith.constant 0 : i32
    %c0_i32_0 = arith.constant 0 : i32
    %c0_i32_1 = arith.constant 0 : i32
    return %c0_i32, %c0_i32_0 : i32, i32
  }
  func.func @transform_1(%arg0: i32, %arg1: memref<6x5xi32, #tpu.memory_space<smem>>) -> (i32, i32) {
    %c0_i32 = arith.constant 0 : i32
    %c0_i32_0 = arith.constant 0 : i32
    %c0_i32_1 = arith.constant 0 : i32
    return %c0_i32, %c0_i32_0 : i32, i32
  }
  func.func @transform_2(%arg0: i32, %arg1: memref<6x5xi32, #tpu.memory_space<smem>>) -> (i32, i32) {
    %c0_i32 = arith.constant 0 : i32
    %c0_i32_0 = arith.constant 0 : i32
    %c0_i32_1 = arith.constant 0 : i32
    return %c0_i32, %c0_i32_0 : i32, i32
  }
  func.func @transform_3(%arg0: i32, %arg1: memref<6x5xi32, #tpu.memory_space<smem>>) -> (i32, i32) {
    %c0_i32 = arith.constant 0 : i32
    %c0_i32_0 = arith.constant 0 : i32
    %c0_i32_1 = arith.constant 0 : i32
    return %c0_i32, %c0_i32_0 : i32, i32
  }
  func.func @transform_4(%arg0: i32, %arg1: memref<6x5xi32, #tpu.memory_space<smem>>) -> (i32, i32) {
    %c0_i32 = arith.constant 0 : i32
    %c0_i32_0 = arith.constant 0 : i32
    %c0_i32_1 = arith.constant 0 : i32
    return %c0_i32, %c0_i32_0 : i32, i32
  }
  func.func @transform_5(%arg0: i32, %arg1: memref<6x5xi32, #tpu.memory_space<smem>>) -> (i32, i32, i32, i32) {
    %c0_i32 = arith.constant 0 : i32
    %c0_i32_0 = arith.constant 0 : i32
    %c0_i32_1 = arith.constant 0 : i32
    %c0_i32_2 = arith.constant 0 : i32
    return %arg0, %c0_i32, %c0_i32_0, %c0_i32_1 : i32, i32, i32, i32
  }
  func.func @transform_6(%arg0: i32, %arg1: memref<6x5xi32, #tpu.memory_space<smem>>) -> (i32, i32, i32) {
    %c0_i32 = arith.constant 0 : i32
    %c0_i32_0 = arith.constant 0 : i32
    %c0_i32_1 = arith.constant 0 : i32
    %c0_i32_2 = arith.constant 0 : i32
    return %c0_i32, %c0_i32_0, %c0_i32_1 : i32, i32, i32
  }
}

</mosaic_0001>

<bundles_post_ra>
// kernel: tile.9
= control target key start
LH: loop header
LB: loop body
LE: loop exit
PB: predicated region body
PF: predicated region fallthrough
CT: control target
= control target key end

     0   :  { %vm6_vm0 = vcmask 1043458   ;;  %vm10_vm1 = vcmask 1045508   ;;  %vm14_vm2 = vcmask 1047558   ;;  %s19_s6 = smov 3  ;;  %s22_s7 = smov 12  ;;  %vm16_vm3 = vcmask 64512   ;;  %s736_s0 = inlined_call_operand.vmem [shape: f32[16,8,8], index: 0, kind: input, shape index: {}]   ;;  %s737_s1 = inlined_call_operand.vmem [shape: f32[128,8], index: 1, kind: output, shape index: {}]  }
   0x1   :  { %v348_v0 = vld [vmem:[%s736_s0 + $0xf] ss:$16 sm:%s19_s6]   ;;  %s27_s12 = smov 48  ;;  %s32_s13 = smov 192  ;;  %vm38_vm4 = vcmask 1048512   ;;  %vm60_vm5 = vcmask 982912  }
   0x2   :  { %v349_v1 = vld [vmem:[%s736_s0 + $0xf] ss:$16 sm:%s22_s7]   ;;  %s63_s18 = smov 3  ;;  %s66_s21 = smov 12  ;;  %vm82_vm6 = vcmask 917312   ;;  %vm104_vm7 = vcmask 851712  }
   0x3   :  { %v25_v2 = vsel %vm6_vm0, %v349_v1, %v348_v0  ;;  %v350_v3 = vld [vmem:[%s736_s0 + $0xf] ss:$16 sm:%s27_s12]   ;;  %v356_v6 = vld [vmem:[%s736_s0 + $0xd] ss:$16 sm:%s63_s18]   ;;  %s71_s22 = smov 48  ;;  %s76_s27 = smov 192 }
   0x4   :  { %v351_v4 = vld [vmem:[%s736_s0 + $0xf] ss:$16 sm:%s32_s13]   ;;  %v30_v5 = vsel %vm10_vm1, %v350_v3, %v25_v2  ;;  %v357_v8 = vld [vmem:[%s736_s0 + $0xd] ss:$16 sm:%s66_s21]   ;;  %s423_s28 = smov 120   ;;  %s41_s2 = smov 3 }
   0x5   :  { %v35_v7 = vsel %vm14_vm2, %v351_v4, %v30_v5  ;;  %v358_v9 = vld [vmem:[%s736_s0 + $0xd] ss:$16 sm:%s71_s22]   ;;  %v69_v10 = vsel %vm6_vm0, %v357_v8, %v356_v6  ;;  %s44_s3 = smov 12  ;;  %v352_v13 = vld [vmem:[%s736_s0 + $0xe] ss:$16 sm:%s41_s2]   ;;  %s49_s8 = smov 48 }
   0x6   :  { %36 = vrot.lane.b32.xlu0 %v35_v7, %s423_s28  ;;  %v359_v11 = vld [vmem:[%s736_s0 + $0xd] ss:$16 sm:%s76_s27]   ;;  %v74_v12 = vsel %vm10_vm1, %v358_v9, %v69_v10  ;;  %s54_s9 = smov 192  ;;  %s85_s14 = smov 3  ;;  %vm126_vm8 = vcmask 786112   ;;  %vm148_vm9 = vcmask 720512  }
   0x7   :  { %v353_v14 = vld [vmem:[%s736_s0 + $0xe] ss:$16 sm:%s44_s3]   ;;  %v79_v15 = vsel %vm14_vm2, %v359_v11, %v74_v12  ;;  %s424_s15 = smov 104   ;;  %v360_v20 = vld [vmem:[%s736_s0 + $0xc] ss:$16 sm:%s85_s14]   ;;  %s88_s18 = smov 12 }
   0x8   :  { %v47_v16 = vsel %vm6_vm0, %v353_v14, %v352_v13  ;;  %v354_v17 = vld [vmem:[%s736_s0 + $0xe] ss:$16 sm:%s49_s8]   ;;  %80 = vrot.lane.b32.xlu1 %v79_v15, %s424_s15  ;;  %s93_s19 = smov 48  ;;  %s98_s24 = smov 192  ;;  %vm170_vm10 = vcmask 654912   ;;  %vm192_vm11 = vcmask 589312  }
   0x9   :  { %v355_v18 = vld [vmem:[%s736_s0 + $0xe] ss:$16 sm:%s54_s9]   ;;  %v52_v19 = vsel %vm10_vm1, %v354_v17, %v47_v16  ;;  %v361_v22 = vld [vmem:[%s736_s0 + $0xc] ss:$16 sm:%s88_s18]   ;;  %s425_s25 = smov 112   ;;  %s107_s28 = smov 3 }
   0xa   :  { %v57_v21 = vsel %vm14_vm2, %v355_v18, %v52_v19  ;;  %v362_v23 = vld [vmem:[%s736_s0 + $0xc] ss:$16 sm:%s93_s19]   ;;  %v91_v24 = vsel %vm6_vm0, %v361_v22, %v360_v20  ;;  %s110_s29 = smov 12  ;;  %v364_v27 = vld [vmem:[%s736_s0 + $0xb] ss:$16 sm:%s107_s28]   ;;  %s115_s5 = smov 48 }
   0xb   :  { %58 = vrot.lane.b32.xlu0 %v57_v21, %s425_s25  ;;  %v363_v25 = vld [vmem:[%s736_s0 + $0xc] ss:$16 sm:%s98_s24]   ;;  %v96_v26 = vsel %vm10_vm1, %v362_v23, %v91_v24  ;;  %s120_s6 = smov 192  ;;  %s129_s11 = smov 3  ;;  %vm214_vm12 = vcmask 523712   ;;  %vm236_vm13 = vcmask 458112  }
   0xc   :  { %v365_v28 = vld [vmem:[%s736_s0 + $0xb] ss:$16 sm:%s110_s29]   ;;  %v101_v29 = vsel %vm14_vm2, %v363_v25, %v96_v26  ;;  %s426_s12 = smov 96   ;;  %v368_v34 = vld [vmem:[%s736_s0 + $0xa] ss:$16 sm:%s129_s11]   ;;  %s132_s15 = smov 12 }
   0xd   :  { %v113_v30 = vsel %vm6_vm0, %v365_v28, %v364_v27  ;;  %v366_v31 = vld [vmem:[%s736_s0 + $0xb] ss:$16 sm:%s115_s5]   ;;  %102 = vrot.lane.b32.xlu1 %v101_v29, %s426_s12  ;;  %s137_s16 = smov 48  ;;  %s142_s21 = smov 192  ;;  %vm258_vm14 = vcmask 392512   ;;  %vm280_vm15 = vcmask 326912  }
   0xe   :  { %v367_v32 = vld [vmem:[%s736_s0 + $0xb] ss:$16 sm:%s120_s6]   ;;  %v118_v33 = vsel %vm10_vm1, %v366_v31, %v113_v30  ;;  %v369_v36 = vld [vmem:[%s736_s0 + $0xa] ss:$16 sm:%s132_s15]   ;;  %s427_s22 = smov 88   ;;  %s151_s25 = smov 3 }
   0xf   :  { %v123_v35 = vsel %vm14_vm2, %v367_v32, %v118_v33  ;;  %v370_v37 = vld [vmem:[%s736_s0 + $0xa] ss:$16 sm:%s137_s16]   ;;  %v135_v38 = vsel %vm6_vm0, %v369_v36, %v368_v34  ;;  %s154_s26 = smov 12  ;;  %v372_v41 = vld [vmem:[%s736_s0 + $0x9] ss:$16 sm:%s151_s25]   ;;  %s159_s2 = smov 48 }
  0x10   :  { %124 = vrot.lane.b32.xlu0 %v123_v35, %s427_s22  ;;  %v371_v39 = vld [vmem:[%s736_s0 + $0xa] ss:$16 sm:%s142_s21]   ;;  %v140_v40 = vsel %vm10_vm1, %v370_v37, %v135_v38  ;;  %s164_s3 = smov 192  ;;  %s173_s8 = smov 3 }
  0x11   :  { %v373_v42 = vld [vmem:[%s736_s0 + $0x9] ss:$16 sm:%s154_s26]   ;;  %v145_v43 = vsel %vm14_vm2, %v371_v39, %v140_v40  ;;  %s428_s9 = smov 80   ;;  %v376_v48 = vld [vmem:[%s736_s0 + $0x8] ss:$16 sm:%s173_s8]   ;;  %s176_s12 = smov 12 }
  0x12   :  { %v157_v44 = vsel %vm6_vm0, %v373_v42, %v372_v41  ;;  %v374_v45 = vld [vmem:[%s736_s0 + $0x9] ss:$16 sm:%s159_s2]   ;;  %146 = vrot.lane.b32.xlu1 %v145_v43, %s428_s9  ;;  %s181_s13 = smov 48  ;;  %s186_s18 = smov 192 }
  0x13   :  { %v375_v46 = vld [vmem:[%s736_s0 + $0x9] ss:$16 sm:%s164_s3]   ;;  %v162_v47 = vsel %vm10_vm1, %v374_v45, %v157_v44  ;;  %v377_v50 = vld [vmem:[%s736_s0 + $0x8] ss:$16 sm:%s176_s12]   ;;  %s429_s19 = smov 72   ;;  %s195_s22 = smov 3 }
  0x14   :  { %v167_v49 = vsel %vm14_vm2, %v375_v46, %v162_v47  ;;  %v378_v51 = vld [vmem:[%s736_s0 + $0x8] ss:$16 sm:%s181_s13]   ;;  %v179_v52 = vsel %vm6_vm0, %v377_v50, %v376_v48  ;;  %s198_s23 = smov 12  ;;  %v380_v55 = vld [vmem:[%s736_s0 + $0x7] ss:$16 sm:%s195_s22]   ;;  %s203_s28 = smov 48 }
  0x15   :  { %168 = vrot.lane.b32.xlu0 %v167_v49, %s429_s19  ;;  %v379_v53 = vld [vmem:[%s736_s0 + $0x8] ss:$16 sm:%s186_s18]   ;;  %v184_v54 = vsel %vm10_vm1, %v378_v51, %v179_v52  ;;  %s208_s29 = smov 192  ;;  %s217_s5 = smov 3 }
  0x16   :  { %v381_v56 = vld [vmem:[%s736_s0 + $0x7] ss:$16 sm:%s198_s23]   ;;  %v189_v57 = vsel %vm14_vm2, %v379_v53, %v184_v54  ;;  %s430_s6 = smov 64   ;;  %v384_v62 = vld [vmem:[%s736_s0 + $0x6] ss:$16 sm:%s217_s5]   ;;  %s220_s9 = smov 12 }
  0x17   :  { %v201_v58 = vsel %vm6_vm0, %v381_v56, %v380_v55  ;;  %v382_v59 = vld [vmem:[%s736_s0 + $0x7] ss:$16 sm:%s203_s28]   ;;  %190 = vrot.lane.b32.xlu1 %v189_v57, %s430_s6  ;;  %s225_s10 = smov 48  ;;  %s230_s15 = smov 192 }
  0x18   :  { %v383_v60 = vld [vmem:[%s736_s0 + $0x7] ss:$16 sm:%s208_s29]   ;;  %v206_v61 = vsel %vm10_vm1, %v382_v59, %v201_v58  ;;  %v385_v0 = vld [vmem:[%s736_s0 + $0x6] ss:$16 sm:%s220_s9]   ;;  %s431_s16 = smov 56   ;;  %s239_s19 = smov 3 }
  0x19   :  { %v211_v63 = vsel %vm14_vm2, %v383_v60, %v206_v61  ;;  %v386_v1 = vld [vmem:[%s736_s0 + $0x6] ss:$16 sm:%s225_s10]   ;;  %v223_v2 = vsel %vm6_vm0, %v385_v0, %v384_v62  ;;  %s242_s20 = smov 12  ;;  %v388_v5 = vld [vmem:[%s736_s0 + $0x5] ss:$16 sm:%s239_s19]   ;;  %s247_s25 = smov 48 }
  0x1a   :  { %212 = vrot.lane.b32.xlu0 %v211_v63, %s431_s16  ;;  %v387_v3 = vld [vmem:[%s736_s0 + $0x6] ss:$16 sm:%s230_s15]   ;;  %v228_v4 = vsel %vm10_vm1, %v386_v1, %v223_v2  ;;  %s252_s26 = smov 192  ;;  %s261_s2 = smov 3 }
  0x1b   :  { %v389_v6 = vld [vmem:[%s736_s0 + $0x5] ss:$16 sm:%s242_s20]   ;;  %v233_v7 = vsel %vm14_vm2, %v387_v3, %v228_v4  ;;  %s432_s3 = smov 48   ;;  %v392_v12 = vld [vmem:[%s736_s0 + $0x4] ss:$16 sm:%s261_s2]   ;;  %s264_s6 = smov 12 }
  0x1c   :  { %v245_v8 = vsel %vm6_vm0, %v389_v6, %v388_v5  ;;  %v390_v9 = vld [vmem:[%s736_s0 + $0x5] ss:$16 sm:%s247_s25]   ;;  %234 = vrot.lane.b32.xlu1 %v233_v7, %s432_s3  ;;  %s269_s7 = smov 48  ;;  %s274_s12 = smov 192 }
  0x1d   :  { %v391_v10 = vld [vmem:[%s736_s0 + $0x5] ss:$16 sm:%s252_s26]   ;;  %v250_v11 = vsel %vm10_vm1, %v390_v9, %v245_v8  ;;  %v393_v14 = vld [vmem:[%s736_s0 + $0x4] ss:$16 sm:%s264_s6]   ;;  %s433_s13 = smov 40   ;;  %s283_s16 = smov 3 }
  0x1e   :  { %v255_v13 = vsel %vm14_vm2, %v391_v10, %v250_v11  ;;  %v394_v15 = vld [vmem:[%s736_s0 + $0x4] ss:$16 sm:%s269_s7]   ;;  %v267_v16 = vsel %vm6_vm0, %v393_v14, %v392_v12  ;;  %s286_s17 = smov 12  ;;  %v396_v19 = vld [vmem:[%s736_s0 + $0x3] ss:$16 sm:%s283_s16]   ;;  %s291_s22 = smov 48 }
  0x1f   :  { %256 = vrot.lane.b32.xlu0 %v255_v13, %s433_s13  ;;  %v395_v17 = vld [vmem:[%s736_s0 + $0x4] ss:$16 sm:%s274_s12]   ;;  %v272_v18 = vsel %vm10_vm1, %v394_v15, %v267_v16  ;;  %s296_s23 = smov 192  ;;  %s305_s28 = smov 3 }
  0x20   :  { %v397_v20 = vld [vmem:[%s736_s0 + $0x3] ss:$16 sm:%s286_s17]   ;;  %v277_v21 = vsel %vm14_vm2, %v395_v17, %v272_v18  ;;  %s434_s29 = smov 32   ;;  %v400_v26 = vld [vmem:[%s736_s0 + $0x2] ss:$16 sm:%s305_s28]   ;;  %s308_s3 = smov 12 }
  0x21   :  { %v289_v22 = vsel %vm6_vm0, %v397_v20, %v396_v19  ;;  %v398_v23 = vld [vmem:[%s736_s0 + $0x3] ss:$16 sm:%s291_s22]   ;;  %278 = vrot.lane.b32.xlu1 %v277_v21, %s434_s29  ;;  %s313_s4 = smov 48  ;;  %s318_s9 = smov 192 }
  0x22   :  { %v399_v24 = vld [vmem:[%s736_s0 + $0x3] ss:$16 sm:%s296_s23]   ;;  %v294_v25 = vsel %vm10_vm1, %v398_v23, %v289_v22  ;;  %v401_v28 = vld [vmem:[%s736_s0 + $0x2] ss:$16 sm:%s308_s3]   ;;  %s435_s10 = smov 24   ;;  %s327_s13 = smov 3 }
  0x23   :  { %v299_v27 = vsel %vm14_vm2, %v399_v24, %v294_v25  ;;  %v402_v29 = vld [vmem:[%s736_s0 + $0x2] ss:$16 sm:%s313_s4]   ;;  %v311_v30 = vsel %vm6_vm0, %v401_v28, %v400_v26  ;;  %s330_s14 = smov 12  ;;  %v404_v33 = vld [vmem:[%s736_s0 + $0x1] ss:$16 sm:%s327_s13]   ;;  %s335_s19 = smov 48 }
  0x24   :  { %300 = vrot.lane.b32.xlu0 %v299_v27, %s435_s10  ;;  %v403_v31 = vld [vmem:[%s736_s0 + $0x2] ss:$16 sm:%s318_s9]   ;;  %v316_v32 = vsel %vm10_vm1, %v402_v29, %v311_v30  ;;  %s340_s20 = smov 192  ;;  %s2_s25 = smov 3 }
  0x25   :  { %v405_v34 = vld [vmem:[%s736_s0 + $0x1] ss:$16 sm:%s330_s14]   ;;  %v321_v35 = vsel %vm14_vm2, %v403_v31, %v316_v32  ;;  %s436_s26 = smov 16   ;;  %s4_s27 = smov 12  ;;  %v3_v40 = vld [vmem:[%s736_s0] ss:$16 sm:%s2_s25]  }
  0x26   :  { %v333_v36 = vsel %vm6_vm0, %v405_v34, %v404_v33  ;;  %v406_v37 = vld [vmem:[%s736_s0 + $0x1] ss:$16 sm:%s335_s19]   ;;  %322 = vrot.lane.b32.xlu1 %v321_v35, %s436_s26  ;;  %s8_s28 = smov 48  ;;  %s12_s2 = smov 192 }
  0x27   :  { %v407_v38 = vld [vmem:[%s736_s0 + $0x1] ss:$16 sm:%s340_s20]   ;;  %v338_v39 = vsel %vm10_vm1, %v406_v37, %v333_v36  ;;  %v5_v42 = vld [vmem:[%s736_s0] ss:$16 sm:%s4_s27]   ;;  %s437_s7 = smov 8  }
  0x28   :  { %v343_v41 = vsel %vm14_vm2, %v407_v38, %v338_v39  ;;  %v9_v43 = vld [vmem:[%s736_s0] ss:$16 sm:%s8_s28]   ;;  %v7_v44 = vsel %vm6_vm0, %v5_v42, %v3_v40  ;;  %vm302_vm0 = vcmask 261312  }
  0x29   :  { %344 = vrot.lane.b32.xlu0 %v343_v41, %s437_s7  ;;  %v13_v45 = vld [vmem:[%s736_s0] ss:$16 sm:%s12_s2]   ;;  %v11_v46 = vsel %vm10_vm1, %v9_v43, %v7_v44  ;;  %vm324_vm1 = vcmask 195712  }
  0x2a   :  { %v15_v47 = vsel %vm14_vm2, %v13_v45, %v11_v46  ;;  %vm346_vm2 = vcmask 130112  }
  0x2b   :  { %17 = vst.msk [vmem:[%s737_s1] sm:$0xff] %vm16_vm3, %v15_v47  }
  0x78   :  { %v37_v48 = vpop.permute.xlu0 %36  }
  0x79   :  { %39 = vst.msk [vmem:[%s737_s1] sm:$0xff] %vm38_vm4, %v37_v48  }
  0x7a   :  { %v81_v49 = vpop.permute.xlu1 %80  }
  0x7d   :  { %v59_v50 = vpop.permute.xlu0 %58  }
  0x7e   :  { %61 = vst.msk [vmem:[%s737_s1] sm:$0xff] %vm60_vm5, %v59_v50  }
  0x7f   :  { %83 = vst.msk [vmem:[%s737_s1] sm:$0xff] %vm82_vm6, %v81_v49   ;;  %v103_v51 = vpop.permute.xlu1 %102  }
  0x80   :  { %105 = vst.msk [vmem:[%s737_s1] sm:$0xff] %vm104_vm7, %v103_v51  }
  0x82   :  { %v125_v52 = vpop.permute.xlu0 %124  }
  0x83   :  { %127 = vst.msk [vmem:[%s737_s1] sm:$0xff] %vm126_vm8, %v125_v52  }
  0x84   :  { %v147_v53 = vpop.permute.xlu1 %146  }
  0x85   :  { %149 = vst.msk [vmem:[%s737_s1] sm:$0xff] %vm148_vm9, %v147_v53  }
  0x87   :  { %v169_v54 = vpop.permute.xlu0 %168  }
  0x88   :  { %171 = vst.msk [vmem:[%s737_s1] sm:$0xff] %vm170_vm10, %v169_v54  }
  0x89   :  { %v191_v55 = vpop.permute.xlu1 %190  }
  0x8a   :  { %193 = vst.msk [vmem:[%s737_s1] sm:$0xff] %vm192_vm11, %v191_v55  }
  0x8c   :  { %v213_v56 = vpop.permute.xlu0 %212  }
  0x8d   :  { %215 = vst.msk [vmem:[%s737_s1] sm:$0xff] %vm214_vm12, %v213_v56  }
  0x8e   :  { %v235_v57 = vpop.permute.xlu1 %234  }
  0x8f   :  { %237 = vst.msk [vmem:[%s737_s1] sm:$0xff] %vm236_vm13, %v235_v57  }
  0x91   :  { %v257_v58 = vpop.permute.xlu0 %256  }
  0x92   :  { %259 = vst.msk [vmem:[%s737_s1] sm:$0xff] %vm258_vm14, %v257_v58  }
  0x93   :  { %v279_v59 = vpop.permute.xlu1 %278  }
  0x94   :  { %281 = vst.msk [vmem:[%s737_s1] sm:$0xff] %vm280_vm15, %v279_v59  }
  0x96   :  { %v301_v60 = vpop.permute.xlu0 %300  }
  0x97   :  { %303 = vst.msk [vmem:[%s737_s1] sm:$0xff] %vm302_vm0, %v301_v60  }
  0x98   :  { %v323_v61 = vpop.permute.xlu1 %322  }
  0x99   :  { %325 = vst.msk [vmem:[%s737_s1] sm:$0xff] %vm324_vm1, %v323_v61  }
  0x9b   :  { %v345_v62 = vpop.permute.xlu0 %344  }
  0x9c   :  { %347 = vst.msk [vmem:[%s737_s1] sm:$0xff] %vm346_vm2, %v345_v62  }

// kernel: search_normal_cell_forward.1
= control target key start
LH: loop header
LB: loop body
LE: loop exit
PB: predicated region body
PF: predicated region fallthrough
CT: control target
= control target key end

     0   :  { %s3176_s0 = inlined_call_operand.vmem [shape: s32[6,5], index: 0, kind: input, shape index: {}]   ;;  %s3177_s1 = inlined_call_operand.vmem [shape: f32[32,48], index: 1, kind: input, shape index: {}]   ;;  %s3178_s2 = inlined_call_operand.vmem [shape: bf16[48,128], index: 2, kind: input, shape index: {}]   ;;  %s3179_s3 = inlined_call_operand.vmem [shape: f32[128,8], index: 3, kind: input, shape index: {}]   ;;  %s3180_s4 = inlined_call_operand.vmem [shape: f32[8,128], index: 4, kind: input, shape index: {}]   ;;  %s3181_s5 = inlined_call_operand.vmem [shape: f32[6,6], index: 5, kind: input, shape index: {}]   ;;  %s3182_s6 = inlined_call_operand.vmem [shape: bf16[6,5,128,256], index: 6, kind: input, shape index: {}]   ;;  %s3183_s7 = inlined_call_operand.vmem [shape: f32[3,32,128], index: 7, kind: output, shape index: {}]  }
   0x1   :  { %s12_s26 = sshll.u32 %s3176_s0, 4  ;;  %s13_s26 = int_to_ptr.vmem [resolvable:$true] %s12_s26 }
   0x2   :  { %s2529_s27 = scalar_lea.vmem %s13_s26, 128  ;;  %p2534_p1 = scmp.lt.s32.totalorder %s13_s26, %s13_s26 }
   0x3   :  { %p2530_p0 = scmp.ne.s32.totalorder %s13_s26, %s2529_s27  ;;  %p2535_p2 = scmp.lt.s32.totalorder %s2529_s27, %s2529_s27 }
   0x5   :  { %p2536_p3 = por %p2535_p2, %p2534_p1 }
   0x7   :  { %p2537_p4 = pnand %p2536_p3, %p2530_p0 }
   0x9   :  { %2540 = shalt.err (!%p2537_p4)  }
   0xa   :  { %s2570_s28 = smov [#allocation6]  }
   0xb   :  { %15 = dma.vmem_to_smem %s13_s26, 128, %s2570_s28, [#allocation5] }
   0xc   :  { %2560 = dma.done.wait [#allocation5], 128 }
   0xd   :  { %2561 = vsyncadd [#allocation5], 4294967168 }
   0xe   :  { %17 = sfence }
   0xf   :  { %18 = vsyncpa [#allocation8], 0  ;;  %s2625_s29 = smov 0  }
  0x10 LB: > { %s2631_s0 = sadd.s32 4294967295, %s2568_s29   ;;  %p1989_p5 = scmp.ge.s32.totalorder %s2568_s29, 1  ;;  %s2568_s29 = sphi %s2625_s29, %s24_s29  }
  0x11   : > { %p181_p6 = scmp.lt.s32.totalorder %s2568_s29, 7  ;;  %s206_s9 = sshll.u32 %s3181_s5, 4  ;;  %s207_s9 = int_to_ptr.vmem [resolvable:$true] %s206_s9 }
  0x12   : > { %p2378_p9 = scmp.eq.s32.totalorder %s2631_s0, 0  ;;  %s2541_s11 = scalar_lea.vmem %s207_s9, 128 }
  0x13   : > { %p2639_p8 = pnand %p1989_p5, %p181_p6  ;;  %p2542_p12 = scmp.ne.s32.totalorder %s207_s9, %s2541_s11 }
  0x14   : > { %p2549_p2 = scmp.lt.s32.totalorder %s207_s9, %s207_s9  ;;  %p2550_p3 = scmp.lt.s32.totalorder %s2541_s11, %s2541_s11 }
  0x15   : > { %p2374_p10 = pneg %p2639_p8 }
  0x16   : > { %p2551_p4 = por %p2550_p3, %p2549_p2 }
  0x17   : > { %p2375_p11 = pnand %p2378_p9, %p2374_p10 }
  0x19   : > { %p2543_p13 = pneg %p2375_p11 }
  0x1b   : > { %p2544_p0 = pnand %p2543_p13, %p2542_p12 }
  0x1d   : > { %p2545_p1 = pneg %p2544_p0 }
  0x1f   : > { %p2552_p7 = pnand %p2551_p4, %p2545_p1 }
  0x21   : > { %2555 = shalt.err (!%p2552_p7)
}
  0x22   : > { %s2571_s12 = smov [#allocation7]   ;;  %227 = sbr.rel (%p2639_p8) target bundleno = 1593 (0x639), region = 44 }
  0x23   : > { %2377 = dma.vmem_to_smem (!%p2375_p11), %s207_s9, 128, %s2571_s12, [#allocation8]  }
  0x29   : > { %2563 = dma.done.wait (%p2378_p9), [#allocation8], 128  }
  0x2a   : > { %2565 = vsyncadd (%p2378_p9), [#allocation8], 4294967168 }
  0x2b   : > { %233 = sfence }
  0x2c   : > { %p253_p5 = scmp.lt.s32.totalorder %s2631_s0, 5  ;;  %p3185_p6 = scmp.ne.s32.totalorder %s2631_s0, 0 }
  0x2d   : > { %v2572_v0 = vmov (!%p3185_p6), -1e+30   ;;  %v2400_v1 = vld [vmem:[%s3178_s2] sm:$0xff] (!%p3185_p6)   ;;  %v2401_v2 = vld [vmem:[%s3178_s2 + $0x8] sm:$0xff] (!%p3185_p6)   ;;  %vm305_vm0 = vcmask (!%p3185_p6), 392192   ;;  %v2573_v5 = vmov (!%p3185_p6), 0.0|0.0  }
  0x2e   : > { %s254_s13 = scalar_select %p253_p5, %s2631_s0, 5 }
  0x2f   : > { %262 = sbr.rel (%p3185_p6) target bundleno = 758 (0x2f6), region = 52  ;;  %269 = vst [vmem:[#allocation4] sm:$0xff] (!%p3185_p6), %v2572_v0  ;;  %270 = vst [vmem:[#allocation4 + $0x8] sm:$0xff] (!%p3185_p6), %v2572_v0  ;;  %2199 = vmatprep.subr.bf16.mxu0 (!%p3185_p6), %v2400_v1  ;;  %v275_v3 = vld [vmem:[%s3177_s1] sm:$0xff] (!%p3185_p6)  ;;  %v276_v4 = vld [vmem:[%s3177_s1 + $0x8] sm:$0xff] (!%p3185_p6)  ;;  %2289 = vmatprep.subr.bf16.mxu1 (!%p3185_p6), %v2573_v5  ;;  %v2574_v34 = vmov (!%p3185_p6), 0.0  }
  0x30   : > { %s2369_s14 = smul.u32 640, %s254_s13  ;;  %271 = vst [vmem:[#allocation4 + $0x10] sm:$0x3] (!%p3185_p6), %v2572_v0  ;;  %272 = vst [vmem:[#allocation4 + $0x18] sm:$0xff] (!%p3185_p6), %v2572_v0  ;;  %2200 = vmatpush3.bf16.msra.mxu0 (!%p3185_p6), %v2400_v1  ;;  %v2402_v6 = vld [vmem:[%s3178_s2 + $0x10] sm:$0xff] (!%p3185_p6)   ;;  %v279_v7 = vpack.c.bf16 (!%p3185_p6), %v276_v4, %v275_v3  ;;  %v387_v8 = vld [vmem:[%s3179_s3] sm:$0xff] (!%p3185_p6) }
  0x31   : > { %273 = vst [vmem:[#allocation4 + $0x20] sm:$0xff] (!%p3185_p6), %v2572_v0  ;;  %274 = vst [vmem:[#allocation4 + $0x28] sm:$0x3] (!%p3185_p6), %v2572_v0  ;;  %2201 = vmatprep.subr.bf16.mxu0 (!%p3185_p6), %v2401_v2  ;;  %v388_v9 = vld [vmem:[%s3179_s3 + $0x8] sm:$0xff] (!%p3185_p6)  ;;  %v389_v10 = vld [vmem:[%s3179_s3 + $0x10] sm:$0xff] (!%p3185_p6)  ;;  %vm2575_vm1 = vmmov (!%p3185_p6), 0  }
  0x32   : > { %s2659_s17 = scalar_lea.vmem %s3182_s6, %s2369_s14  ;;  %v390_v11 = vld [vmem:[%s3179_s3 + $0x18] sm:$0xff] (!%p3185_p6)  ;;  %2205 = vmatprep.mubr.msk.bf16.mxu0 (!%p3185_p6), %vm305_vm0, %v279_v7  ;;  %v2290_v12 = vpack.c.bf16 (!%p3185_p6), %v388_v9, %v387_v8  ;;  %v277_v13 = vld [vmem:[%s3177_s1 + $0x10] sm:$0xff] (!%p3185_p6)  ;;  %v391_v17 = vld [vmem:[%s3179_s3 + $0x20] sm:$0xff] (!%p3185_p6)  ;;  %263 = vst [vmem:[#allocation3] sm:$0xff] (!%p3185_p6), %v2574_v34  ;;  %2241 = vmatprep.mubr.msk.f32.mxu1 (!%p3185_p6), %vm2575_vm1, %v2574_v34  ;;  %vm383_vm2 = vcmask (!%p3185_p6), 1040384   ;;  %vm385_vm3 = vcmask (!%p3185_p6), 1041408  }
  0x33   : > { %v278_v14 = vld [vmem:[%s3177_s1 + $0x18] sm:$0xff] (!%p3185_p6)  ;;  %v2293_v15 = vpack.c.bf16 (!%p3185_p6), %v390_v11, %v389_v10  ;;  %v392_v18 = vld [vmem:[%s3179_s3 + $0x28] sm:$0xff] (!%p3185_p6)  ;;  %v393_v20 = vld [vmem:[%s3179_s3 + $0x30] sm:$0xff] (!%p3185_p6)  ;;  %264 = vst [vmem:[#allocation3 + $0x8] sm:$0xff] (!%p3185_p6), %v2574_v34  ;;  %vm493_vm4 = vcmask (!%p3185_p6), 64512  }
  0x34   : > { %2202 = vmatpush3.bf16.msra.mxu0 (!%p3185_p6), %v2401_v2  ;;  %2291 = vmatpush3.bf16.msra.mxu1 (!%p3185_p6), %v2290_v12  ;;  %v280_v16 = vpack.c.bf16 (!%p3185_p6), %v278_v14, %v277_v13  ;;  %v2296_v19 = vpack.c.bf16 (!%p3185_p6), %v392_v18, %v391_v17  ;;  %v394_v21 = vld [vmem:[%s3179_s3 + $0x38] sm:$0xff] (!%p3185_p6)  ;;  %v395_v23 = vld [vmem:[%s3179_s3 + $0x40] sm:$0xff] (!%p3185_p6)  ;;  %v396_v24 = vld [vmem:[%s3179_s3 + $0x48] sm:$0xff] (!%p3185_p6)  ;;  %265 = vst [vmem:[#allocation3 + $0x10] sm:$0xf] (!%p3185_p6), %v2574_v34 }
  0x35   : > { %2203 = vmatprep.subr.bf16.mxu0 (!%p3185_p6), %v2402_v6  ;;  %2292 = vmatprep.subr.bf16.mxu1 (!%p3185_p6), %v2573_v5  ;;  %v2299_v22 = vpack.c.bf16 (!%p3185_p6), %v394_v21, %v393_v20  ;;  %v2302_v25 = vpack.c.bf16 (!%p3185_p6), %v396_v24, %v395_v23  ;;  %v397_v26 = vld [vmem:[%s3179_s3 + $0x50] sm:$0xff] (!%p3185_p6)  ;;  %v398_v27 = vld [vmem:[%s3179_s3 + $0x58] sm:$0xff] (!%p3185_p6)  ;;  %v399_v29 = vld [vmem:[%s3179_s3 + $0x60] sm:$0xff] (!%p3185_p6)  ;;  %266 = vst [vmem:[#allocation3 + $0x18] sm:$0xff] (!%p3185_p6), %v2574_v34 }
  0x36   : > { %v2305_v28 = vpack.c.bf16 %v398_v27, %v397_v26  ;;  %v400_v30 = vld [vmem:[%s3179_s3 + $0x68] sm:$0xff]  ;;  %v401_v32 = vld [vmem:[%s3179_s3 + $0x70] sm:$0xff]  ;;  %v402_v33 = vld [vmem:[%s3179_s3 + $0x78] sm:$0xff]  ;;  %267 = vst [vmem:[#allocation3 + $0x20] sm:$0xff] %v2574_v34 }
  0x37   : > { %v2308_v31 = vpack.c.bf16 %v400_v30, %v399_v29  ;;  %268 = vst [vmem:[#allocation3 + $0x28] sm:$0xf] %v2574_v34  ;;  %v2311_v35 = vpack.c.bf16 %v402_v33, %v401_v32  ;;  %v492_v63 = vld [vmem:[%s3180_s4] sm:$0xff] }
  0x38   : > { %2204 = vmatpush3.bf16.msra.mxu0 %v2402_v6  ;;  %2294 = vmatpush3.bf16.msra.mxu1 %v2293_v15  ;;  %v567_v15 = vlaneseq }
  0x39   : > { %2295 = vmatprep.subr.bf16.mxu1 %v2573_v5  ;;  %2244 = vmatprep.subr.mxu0 %v2574_v34 }
  0x3b   : > { %2206 = vmatmul.mubr.msk.bf16.vlgmr.msra.gmra.mrb[0].mxu0 %vm305_vm0, %v280_v16  ;;  %v568_v16 = vshrl.u32 %v567_v15, 7 }
  0x3c   : > { %2297 = vmatpush3.bf16.msra.mxu1 %v2296_v19  ;;  %2246 = vmatprep.mubr.msk.f32.mxu0 %vm2575_vm1, %v2574_v34 }
  0x3d   : > { %2298 = vmatprep.subr.bf16.mxu1 %v2573_v5  ;;  %2245 = vmatpush3.msra.mxu0 %v492_v63  ;;  %v569_v17 = vsub.s32 0, %v568_v16  ;;  %v577_v18 = vsub.s32 1, %v568_v16 }
  0x40   : > { %2300 = vmatpush3.bf16.msra.mxu1 %v2299_v22 }
  0x41   : > { %2301 = vmatprep.subr.bf16.mxu1 %v2573_v5 }
  0x44   : > { %2303 = vmatpush3.bf16.msra.mxu1 %v2302_v25 }
  0x45   : > { %2304 = vmatprep.subr.bf16.mxu1 %v2573_v5 }
  0x48   : > { %2306 = vmatpush3.bf16.msra.mxu1 %v2305_v28 }
  0x49   : > { %2307 = vmatprep.subr.bf16.mxu1 %v2573_v5 }
  0x4c   : > { %2309 = vmatpush3.bf16.msra.mxu1 %v2308_v31 }
  0x4d   : > { %2310 = vmatprep.subr.bf16.mxu1 %v2573_v5 }
  0x50   : > { %2312 = vmatpush3.bf16.msra.mxu1 %v2311_v35 }
 0x10e   : > { %v2207_v36 = vpop.f32.mrb[0].mxu0 }
 0x10f   : > { %v346_v37 = vpop.f32.mrb[1].mxu0  ;;  %v372_v43 = vmul.f32 %v2207_v36, %v2207_v36 }
 0x110   : > { %v2208_v38 = vpop.f32.mrb[2].mxu0  ;;  %v370_v40 = vmul.f32 %v346_v37, %v346_v37 }
 0x111   : > { %v349_v39 = vpop.f32.mrb[3].mxu0  ;;  %v373_v46 = vmul.f32 %v2208_v38, %v2208_v38 }
 0x112   : > { %v361_v41 = vadd.f32 %v349_v39, %v346_v37  ;;  %v371_v42 = vmul.f32 %v349_v39, %v349_v39 }
 0x114   : > { %v362_v44 = vadd.f32 %v2207_v36, %v361_v41  ;;  %v374_v45 = vadd.f32 %v371_v42, %v370_v40 }
 0x116   : > { %v363_v47 = vadd.f32 %v2208_v38, %v362_v44  ;;  %v375_v48 = vadd.f32 %v374_v45, %v372_v43 }
 0x118   : > { %v364_v49 = vrot.slane %v363_v47, 4  ;;  %v376_v50 = vadd.f32 %v375_v48, %v373_v46 }
 0x11a   : > { %v365_v51 = vadd.f32 %v364_v49, %v363_v47  ;;  %v377_v52 = vrot.slane %v376_v50, 4 }
 0x11c   : > { %v366_v53 = vrot.slane %v365_v51, 2  ;;  %v378_v54 = vadd.f32 %v377_v52, %v376_v50 }
 0x11e   : > { %v367_v55 = vadd.f32 %v366_v53, %v365_v51  ;;  %v379_v56 = vrot.slane %v378_v54, 2 }
 0x120   : > { %v368_v57 = vrot.slane %v367_v55, 1  ;;  %v380_v58 = vadd.f32 %v379_v56, %v378_v54 }
 0x122   : > { %v381_v59 = vrot.slane %v380_v58, 1  ;;  %v369_v60 = vadd.f32 %v368_v57, %v367_v55 }
 0x124   : > { %v382_v61 = vadd.f32 %v381_v59, %v380_v58 }
 0x126   : > { %v384_v62 = vsel %vm383_vm2, %v369_v60, %v382_v61 }
 0x127   : > { %2242 = vmatmul.mubr.msk.f32.vlgmr.msra.gmra.mrb[0].mxu1 %vm385_vm3, %v384_v62 }
 0x1fa   : > { %v469_v0 = vpop.f32.mrb[0].mxu1 }
 0x1fb   : > { %v473_v1 = vmul.f32 0.001953125, %v469_v0  ;;  %v2243_v2 = vpop.f32.mrb[1].mxu1 }
 0x1fd   : > { %v474_v3 = vmul.f32 %v473_v1, %v473_v1  ;;  %v482_v9 = vsub.f32 0.0, %v473_v1 }
 0x1ff   : > { %v476_v4 = vrot.slane %v474_v3, 7 }
 0x201   : > { %v478_v5 = vsub.f32 %v473_v1, %v476_v4 }
 0x203   : > { %v479_v6 = vmax.f32 %v478_v5, 0.0 }
 0x205   : > { %v480_v7 = vadd.f32 1e-05, %v479_v6 }
 0x207   : > { %2403 = vrsqrt.f32 %v480_v7 }
 0x211   : > { %v2404_v8 = vpop.eup %2403 }
 0x212   : > { %v484_v10 = vrot.slane %v2404_v8, 1 }
 0x214   : > { %v486_v11 = vmul.f32 %v484_v10, %v482_v9 }
 0x216   : > { %v488_v12 = vrot.slane %v486_v11, 7 }
 0x218   : > { %v490_v13 = vsel %vm383_vm2, %v484_v10, %v488_v12 }
 0x219   : > { %v491_v14 = vsel %vm385_vm3, %v490_v13, 0.0 }
 0x21a   : > { %2247 = vmatmul.mubr.msk.f32.vlgmr.msra.gmra.mrb[4].mxu0 %vm493_vm4, %v491_v14 }
 0x2ed   : > { %v563_v19 = vpop.f32.mrb[4].mxu0 }
 0x2ee   : > { %v570_v20 = vrot.slane %v563_v19, %v569_v17  ;;  %v2248_v21 = vpop.f32.mrb[5].mxu0  ;;  %v578_v22 = vrot.slane %v563_v19, %v577_v18 }
 0x2f0   : > { %v571_v23 = vmul.f32 %v570_v20, %v346_v37  ;;  %v572_v24 = vmul.f32 %v570_v20, %v349_v39  ;;  %v573_v25 = vmul.f32 %v2207_v36, %v570_v20  ;;  %v574_v26 = vmul.f32 %v2208_v38, %v570_v20 }
 0x2f2   : > { %v579_v27 = vadd.f32 %v578_v22, %v571_v23  ;;  %v580_v28 = vadd.f32 %v578_v22, %v572_v24  ;;  %v581_v29 = vadd.f32 %v578_v22, %v573_v25  ;;  %v582_v30 = vadd.f32 %v578_v22, %v574_v26 }
 0x2f4   : > { %583 = vst [vmem:[#allocation2] sm:$0xff] %v579_v27  ;;  %584 = vst [vmem:[#allocation2 + $0x8] sm:$0xff] %v580_v28 }
 0x2f5   : > { %585 = vst [vmem:[#allocation2 + $0x10] sm:$0xff] %v581_v29  ;;  %586 = vst [vmem:[#allocation2 + $0x18] sm:$0xff] %v582_v30 }
 0x2f6 PF: > { %v2405_v31 = vld [vmem:[%s2659_s17 + $0x84] ss:$8 sps:$4 sm:$0xff]   ;;  %v2576_v33 = vmov 0   ;;  %v2409_v34 = vld [vmem:[%s2659_s17 + $0x80] ss:$8 sps:$4 sm:$0xff]   ;;  %s2753_s24 = sshll.u32 %s2631_s0, 7 }
 0x2f7   : > { %v2407_v32 = vld [vmem:[%s2659_s17 + $0x104] ss:$8 sps:$4 sm:$0xff]   ;;  %768 = vmatprep.mubr.bf16.mxu1 %v2576_v33  ;;  %1057 = vmatprep.mubr.bf16.mxu0 %v2576_v33  ;;  %v2410_v35 = vld [vmem:[%s2659_s17 + $0x100] ss:$8 sps:$4 sm:$0xff]   ;;  %v2411_v36 = vld [vmem:[%s2659_s17 + $0x94] ss:$8 sps:$4 sm:$0xff]  }
 0x2f8   : > { %736 = vmatprep.subr.bf16.mxu1 %v2405_v31  ;;  %1025 = vmatprep.subr.bf16.mxu0 %v2407_v32  ;;  %v2413_v37 = vld [vmem:[%s2659_s17 + $0x114] ss:$8 sps:$4 sm:$0xff]   ;;  %v2415_v38 = vld [vmem:[%s2659_s17 + $0x90] ss:$8 sps:$4 sm:$0xff]   ;;  %v2417_v40 = vld [vmem:[%s2659_s17 + $0xa4] ss:$8 sps:$4 sm:$0xff]  }
 0x2f9   : > { %737 = vmatpush1.bf16.msra.mxu1 %v2409_v34  ;;  %1026 = vmatpush1.bf16.msra.mxu0 %v2410_v35  ;;  %v2416_v39 = vld [vmem:[%s2659_s17 + $0x110] ss:$8 sps:$4 sm:$0xff]   ;;  %v2419_v41 = vld [vmem:[%s2659_s17 + $0x124] ss:$8 sps:$4 sm:$0xff]   ;;  %v2421_v42 = vld [vmem:[%s2659_s17 + $0xa0] ss:$8 sps:$4 sm:$0xff]  }
 0x2fa   : > { %738 = vmatprep.subr.bf16.mxu1 %v2411_v36  ;;  %1027 = vmatprep.subr.bf16.mxu0 %v2413_v37  ;;  %v2422_v43 = vld [vmem:[%s2659_s17 + $0x120] ss:$8 sps:$4 sm:$0xff]   ;;  %v2423_v44 = vld [vmem:[%s2659_s17 + $0xb4] ss:$8 sps:$4 sm:$0xff]   ;;  %s2761_s25 = sld [smem:[#allocation6 + %s2753_s24]]  ;;  %s2577_s27 = smov 8  }
 0x2fb   : > { %v2425_v45 = vld [vmem:[%s2659_s17 + $0x134] ss:$8 sps:$4 sm:$0xff]   ;;  %v2427_v46 = vld [vmem:[%s2659_s17 + $0xb0] ss:$8 sps:$4 sm:$0xff]   ;;  %v2429_v48 = vld [vmem:[%s2659_s17 + $0xc4] ss:$8 sps:$4 sm:$0xff]  }
 0x2fc   : > { %v2428_v47 = vld [vmem:[%s2659_s17 + $0x130] ss:$8 sps:$4 sm:$0xff]   ;;  %v2431_v49 = vld [vmem:[%s2659_s17 + $0x144] ss:$8 sps:$4 sm:$0xff]   ;;  %v2433_v50 = vld [vmem:[%s2659_s17 + $0xc0] ss:$8 sps:$4 sm:$0xff]  }
 0x2fd   : > { %739 = vmatpush1.bf16.msra.mxu1 %v2415_v38  ;;  %1028 = vmatpush1.bf16.msra.mxu0 %v2416_v39  ;;  %v2434_v51 = vld [vmem:[%s2659_s17 + $0x140] ss:$8 sps:$4 sm:$0xff]   ;;  %v2435_v52 = vld [vmem:[%s2659_s17 + $0xd4] ss:$8 sps:$4 sm:$0xff]   ;;  %v2439_v54 = vld [vmem:[%s2659_s17 + $0xd0] ss:$8 sps:$4 sm:$0xff]  }
 0x2fe   : > { %740 = vmatprep.subr.bf16.mxu1 %v2417_v40  ;;  %1029 = vmatprep.subr.bf16.mxu0 %v2419_v41  ;;  %v2437_v53 = vld [vmem:[%s2659_s17 + $0x154] ss:$8 sps:$4 sm:$0xff]   ;;  %v2440_v55 = vld [vmem:[%s2659_s17 + $0x150] ss:$8 sps:$4 sm:$0xff]   ;;  %v2441_v56 = vld [vmem:[%s2659_s17 + $0xe4] ss:$8 sps:$4 sm:$0xff]  }
 0x2ff   : > { %v2443_v57 = vld [vmem:[%s2659_s17 + $0x164] ss:$8 sps:$4 sm:$0xff]   ;;  %v2445_v58 = vld [vmem:[%s2659_s17 + $0xe0] ss:$8 sps:$4 sm:$0xff]   ;;  %v2447_v62 = vld [vmem:[%s2659_s17 + $0xf4] ss:$8 sps:$4 sm:$0xff]  }
 0x300   : > { %s2004_s0 = sshll.u32 %s2761_s25, 5  ;;  %v2446_v59 = vld [vmem:[%s2659_s17 + $0x160] ss:$8 sps:$4 sm:$0xff]   ;;  %v2449_v63 = vld [vmem:[%s2659_s17 + $0x174] ss:$8 sps:$4 sm:$0xff]   ;;  %s2578_s28 = smov 120  }
 0x301   : > { %741 = vmatpush1.bf16.msra.mxu1 %v2421_v42  ;;  %1030 = vmatpush1.bf16.msra.mxu0 %v2422_v43  ;;  %s2778_s26 = scalar_lea.vmem [#allocation2], %s2004_s0  ;;  %v2451_v0 = vld [vmem:[%s2659_s17 + $0xf0] ss:$8 sps:$4 sm:$0xff]   ;;  %v2455_v2 = vld [vmem:[%s2659_s17 + $0x4] ss:$8 sps:$4 sm:$0xff]   ;;  %vm2580_vm5 = vmmov 0  }
 0x302   : > { %742 = vmatprep.subr.bf16.mxu1 %v2423_v44  ;;  %1031 = vmatprep.subr.bf16.mxu0 %v2425_v45  ;;  %v2781_v60 = vld [vmem:[%s2778_s26] sm:$0xff]  ;;  %v2784_v61 = vld [vmem:[%s2778_s26 + $0x8] sm:$0xff]  ;;  %v2452_v1 = vld [vmem:[%s2659_s17 + $0x170] ss:$8 sps:$4 sm:$0xff]   ;;  %vm1446_vm6 = vcmask 64512   ;;  %vm1467_vm7 = vcmask 982016  }
 0x303   : > { %603 = vst [vmem:[#allocation3 + $0x2] sm:$0xff] %v2781_v60  ;;  %604 = vst [vmem:[#allocation3 + $0xa] sm:$0xff] %v2784_v61  ;;  %v2458_v3 = vld [vmem:[%s2659_s17 + $0x184] ss:$8 sps:$4 sm:$0xff]   ;;  %v2453_v4 = vld [vmem:[%s2659_s17] ss:$8 sps:$4 sm:$0xff]   ;;  %v926_v6 = vpack.c.bf16 %v2784_v61, %v2781_v60 }
 0x304   : > { %607 = vst [vmem:[#allocation4 + $0x1] sm:$0xff] %v2781_v60  ;;  %608 = vst [vmem:[#allocation4 + $0x9] sm:$0xff] %v2784_v61  ;;  %v2456_v5 = vld [vmem:[%s2659_s17 + $0x180] ss:$8 sps:$4 sm:$0xff]   ;;  %v2461_v9 = vld [vmem:[%s2659_s17 + $0x14] ss:$8 sps:$4 sm:$0xff]  }
 0x305   : > { %743 = vmatpush1.bf16.msra.mxu1 %v2427_v46  ;;  %1032 = vmatpush1.bf16.msra.mxu0 %v2428_v47  ;;  %v2464_v11 = vld [vmem:[%s2659_s17 + $0x194] ss:$8 sps:$4 sm:$0xff]   ;;  %v2459_v12 = vld [vmem:[%s2659_s17 + $0x10] ss:$8 sps:$4 sm:$0xff]   ;;  %v2467_v14 = vld [vmem:[%s2659_s17 + $0x24] ss:$8 sps:$4 sm:$0xff]  }
 0x306   : > { %744 = vmatprep.subr.bf16.mxu1 %v2429_v48  ;;  %1033 = vmatprep.subr.bf16.mxu0 %v2431_v49  ;;  %v2462_v13 = vld [vmem:[%s2659_s17 + $0x190] ss:$8 sps:$4 sm:$0xff]   ;;  %v2470_v15 = vld [vmem:[%s2659_s17 + $0x1a4] ss:$8 sps:$4 sm:$0xff]   ;;  %v2465_v18 = vld [vmem:[%s2659_s17 + $0x20] ss:$8 sps:$4 sm:$0xff]  }
 0x307   : > { %v2808_v16 = vld [vmem:[%s2778_s26 + $0x10] sm:$0xff]  ;;  %v2812_v17 = vld [vmem:[%s2778_s26 + $0x18] sm:$0xff]  ;;  %v2468_v19 = vld [vmem:[%s2659_s17 + $0x1a0] ss:$8 sps:$4 sm:$0xff]   ;;  %vm1620_vm8 = vcmask 1040384   ;;  %vm1622_vm9 = vcmask 1041408  }
 0x308   : > { %605 = vst [vmem:[#allocation3 + $0x1a] sm:$0xff] %v2808_v16  ;;  %609 = vst [vmem:[#allocation4 + $0x19] sm:$0xff] %v2808_v16  ;;  %v927_v20 = vpack.c.bf16 %v2812_v17, %v2808_v16  ;;  %v2473_v21 = vld [vmem:[%s2659_s17 + $0x34] ss:$8 sps:$4 sm:$0xff]   ;;  %v2471_v23 = vld [vmem:[%s2659_s17 + $0x30] ss:$8 sps:$4 sm:$0xff]  }
 0x309   : > { %745 = vmatpush1.bf16.msra.mxu1 %v2433_v50  ;;  %1034 = vmatpush1.bf16.msra.mxu0 %v2434_v51  ;;  %606 = vst [vmem:[#allocation3 + $0x22] sm:$0xff] %v2812_v17  ;;  %610 = vst [vmem:[#allocation4 + $0x21] sm:$0xff] %v2812_v17  ;;  %v2476_v22 = vld [vmem:[%s2659_s17 + $0x1b4] ss:$8 sps:$4 sm:$0xff]   ;;  %v2474_v24 = vld [vmem:[%s2659_s17 + $0x1b0] ss:$8 sps:$4 sm:$0xff]  }
 0x30a   : > { %746 = vmatprep.subr.bf16.mxu1 %v2435_v52  ;;  %1035 = vmatprep.subr.bf16.mxu0 %v2437_v53  ;;  %v633_v7 = vld [vmem:[#allocation3 + $0x1] sm:$0xff]  ;;  %v634_v8 = vld [vmem:[#allocation3 + $0x9] sm:$0xff]  ;;  %v2485_v32 = vld [vmem:[%s2659_s17 + $0x54] ss:$8 sps:$4 sm:$0xff]   ;;  %vm1624_vm10 = vcmask 1042432   ;;  %vm1626_vm11 = vcmask 1043456  }
 0x30b   : > { %v637_v10 = vpack.c.bf16 %v634_v8, %v633_v7  ;;  %v2479_v25 = vld [vmem:[%s2659_s17 + $0x44] ss:$8 sps:$4 sm:$0xff]   ;;  %v1476_v26 = vadd.f32 %v633_v7, %v2781_v60  ;;  %v2477_v28 = vld [vmem:[%s2659_s17 + $0x40] ss:$8 sps:$4 sm:$0xff]   ;;  %v1477_v31 = vadd.f32 %v634_v8, %v2784_v61  ;;  %v2488_v36 = vld [vmem:[%s2659_s17 + $0x1d4] ss:$8 sps:$4 sm:$0xff]  }
 0x30c   : > { %v2482_v27 = vld [vmem:[%s2659_s17 + $0x1c4] ss:$8 sps:$4 sm:$0xff]   ;;  %v2480_v29 = vld [vmem:[%s2659_s17 + $0x1c0] ss:$8 sps:$4 sm:$0xff]   ;;  %v2483_v41 = vld [vmem:[%s2659_s17 + $0x50] ss:$8 sps:$4 sm:$0xff]  }
 0x30d   : > { %747 = vmatpush1.bf16.msra.mxu1 %v2439_v54  ;;  %1036 = vmatpush1.bf16.msra.mxu0 %v2440_v55  ;;  %v2834_v35 = vld [vmem:[#allocation3 + $0x3] sm:$0xff]  ;;  %v1087_v39 = vld [vmem:[#allocation3 + $0xb] sm:$0xff]  ;;  %v2497_v49 = vld [vmem:[%s2659_s17 + $0x74] ss:$8 sps:$4 sm:$0xff]   ;;  %vm1628_vm12 = vcmask 1044480   ;;  %vm1630_vm13 = vcmask 1045504  }
 0x30e   : > { %748 = vmatprep.subr.bf16.mxu1 %v2441_v56  ;;  %1037 = vmatprep.subr.bf16.mxu0 %v2443_v57  ;;  %v2838_v38 = vadd.f32 %v1476_v26, %v2834_v35  ;;  %v2842_v40 = vadd.f32 %v1477_v31, %v1087_v39  ;;  %v2486_v42 = vld [vmem:[%s2659_s17 + $0x1d0] ss:$8 sps:$4 sm:$0xff]   ;;  %v2491_v43 = vld [vmem:[%s2659_s17 + $0x64] ss:$8 sps:$4 sm:$0xff]   ;;  %v2489_v46 = vld [vmem:[%s2659_s17 + $0x60] ss:$8 sps:$4 sm:$0xff]  }
 0x30f   : > { %v635_v30 = vld [vmem:[#allocation3 + $0x19] sm:$0xff]  ;;  %v2494_v45 = vld [vmem:[%s2659_s17 + $0x1e4] ss:$8 sps:$4 sm:$0xff]   ;;  %v1414_v56 = vld [vmem:[#allocation4] sm:$0xff]  ;;  %vm1632_vm14 = vcmask 1046528   ;;  %s589_s19 = sadd.s32 1, %s2753_s24 }
 0x310   : > { %v636_v34 = vld [vmem:[#allocation3 + $0x21] sm:$0xff]  ;;  %1488 = vrot.lane.b32.xlu0 %v2838_v38, %s2577_s27  ;;  %v1478_v44 = vadd.f32 %v635_v30, %v2808_v16  ;;  %v2500_v51 = vld [vmem:[%s2659_s17 + $0x1f4] ss:$8 sps:$4 sm:$0xff]   ;;  %v2495_v52 = vld [vmem:[%s2659_s17 + $0x70] ss:$8 sps:$4 sm:$0xff]   ;;  %s3114_s20 = sld [smem:[#allocation6 + %s589_s19]] }
 0x311   : > { %749 = vmatpush1.bf16.msra.mxu1 %v2445_v58  ;;  %1038 = vmatpush1.bf16.msra.mxu0 %v2446_v59  ;;  %v638_v37 = vpack.c.bf16 %v636_v34, %v635_v30  ;;  %v2492_v47 = vld [vmem:[%s2659_s17 + $0x1e0] ss:$8 sps:$4 sm:$0xff]   ;;  %v2498_v53 = vld [vmem:[%s2659_s17 + $0x1f0] ss:$8 sps:$4 sm:$0xff]   ;;  %v2503_v59 = vld [vmem:[%s2659_s17 + $0x204] ss:$8 sps:$4 sm:$0xff]  }
 0x312   : > { %750 = vmatprep.subr.bf16.mxu1 %v2447_v62  ;;  %1039 = vmatprep.subr.bf16.mxu0 %v2449_v63  ;;  %v2854_v48 = vld [vmem:[#allocation3 + $0x1b] sm:$0xff]  ;;  %v612_v55 = vld [vmem:[#allocation3 + $0x8] sm:$0xff]  ;;  %v1422_v57 = vld [vmem:[#allocation4 + $0x2] sm:$0xff]  ;;  %v1418_v62 = vmax.f32 %v1414_v56, %v2781_v60  ;;  %s595_s21 = sadd.s32 4, %s2753_s24  ;;  %s591_s23 = sadd.s32 2, %s2753_s24 }
 0x313   : > { %v2858_v50 = vadd.f32 %v1478_v44, %v2854_v48  ;;  %v611_v54 = vld [vmem:[#allocation3] sm:$0xff]  ;;  %v1415_v58 = vld [vmem:[#allocation4 + $0x8] sm:$0xff]  ;;  %s3117_s22 = sld [smem:[#allocation6 + %s595_s21]]  ;;  %s593_s25 = sadd.s32 3, %s2753_s24 }
 0x314   : > { %1490 = vrot.lane.b32.xlu0 %v2842_v40, %s2577_s27  ;;  %v1419_v63 = vmax.f32 %v1415_v58, %v2784_v61  ;;  %v2506_v60 = vld [vmem:[%s2659_s17 + $0x214] ss:$8 sps:$4 sm:$0xff]   ;;  %v1089_v61 = vld [vmem:[#allocation3 + $0x23] sm:$0xff]  ;;  %v2510_v26 = vld [vmem:[%s2659_s17 + $0x230] ss:$8 sps:$4 sm:$0xff]   ;;  %s3123_s0 = sld [smem:[#allocation6 + %s591_s23]] }
 0x315   : > { %751 = vmatpush1.bf16.msra.mxu1 %v2451_v0  ;;  %1040 = vmatpush1.bf16.msra.mxu0 %v2452_v1  ;;  %v1479_v0 = vadd.f32 %v636_v34, %v2812_v17  ;;  %v615_v1 = vpack.c.bf16 %v612_v55, %v611_v54  ;;  %v2516_v30 = vld [vmem:[%s2659_s17 + $0x250] ss:$8 sps:$4 sm:$0xff]   ;;  %v2521_v31 = vld [vmem:[%s2659_s17 + $0x264] ss:$8 sps:$4 sm:$0xff]   ;;  %v2524_v34 = vld [vmem:[%s2659_s17 + $0x274] ss:$8 sps:$4 sm:$0xff]  }
 0x316   : > { %869 = vmatprep.subr.bf16.mxu1 %v2455_v2  ;;  %1189 = vmatprep.subr.bf16.mxu0 %v2458_v3  ;;  %v1090_v2 = vpack.c.bf16 %v1087_v39, %v2834_v35  ;;  %v2872_v3 = vmax.f32 %v1418_v62, %v1422_v57  ;;  %v2522_v35 = vld [vmem:[%s2659_s17 + $0x270] ss:$8 sps:$4 sm:$0xff]   ;;  %v1634_v44 = vld [vmem:[%s3179_s3] sm:$0xff]  ;;  %v1643_v58 = vld [vmem:[%s3179_s3 + $0x48] sm:$0xff]  ;;  %s3125_s26 = sld [smem:[#allocation6 + %s593_s25]] }
 0x317   : > { %v2882_v8 = vadd.f32 %v1479_v0, %v1089_v61  ;;  %v1640_v54 = vld [vmem:[%s3179_s3 + $0x30] sm:$0xff]  ;;  %v1641_v55 = vld [vmem:[%s3179_s3 + $0x38] sm:$0xff]  ;;  %v1642_v57 = vld [vmem:[%s3179_s3 + $0x40] sm:$0xff]  ;;  %s1812_s30 = sld [smem:[#allocation7 + %s589_s19]] }
 0x318   : > { %769 = vmatmul.mubr.bf16.vlgmr.msra.gmra.mrb[0].mxu1 %v637_v10  ;;  %1058 = vmatmul.mubr.bf16.vlgmr.msra.gmra.mrb[0].mxu0 %v926_v6  ;;  %v2501_v6 = vld [vmem:[%s2659_s17 + $0x200] ss:$8 sps:$4 sm:$0xff]   ;;  %v2323_v56 = vpack.c.bf16 %v1641_v55, %v1640_v54  ;;  %v1644_v62 = vld [vmem:[%s3179_s3 + $0x50] sm:$0xff]  ;;  %s1813_s8 = sld [smem:[#allocation7 + %s591_s23]] }
 0x319   : > { %870 = vmatpush1.bf16.msra.mxu1 %v2453_v4  ;;  %1190 = vmatpush1.bf16.msra.mxu0 %v2456_v5  ;;  %v1423_v4 = vld [vmem:[#allocation4 + $0xa] sm:$0xff]  ;;  %v1417_v5 = vld [vmem:[#allocation4 + $0x20] sm:$0xff]  ;;  %v1416_v10 = vld [vmem:[#allocation4 + $0x18] sm:$0xff]  ;;  %s1815_s9 = sld [smem:[#allocation7 + %s595_s21]] }
 0x31a   : > { %871 = vmatprep.subr.bf16.mxu1 %v2461_v9  ;;  %1191 = vmatprep.subr.bf16.mxu0 %v2464_v11  ;;  %v2878_v7 = vmax.f32 %v1419_v63, %v1423_v4  ;;  %v1421_v9 = vmax.f32 %v1417_v5, %v2812_v17  ;;  %v1425_v11 = vld [vmem:[#allocation4 + $0x22] sm:$0xff]  ;;  %p1900_p8 = scmp.eq.s32.totalorder %s3123_s0, 1 }
 0x31b   : > { %778 = vmatprep.mubr.bf16.mxu1 %v2576_v33  ;;  %1067 = vmatprep.mubr.bf16.mxu0 %v2576_v33  ;;  %v1645_v63 = vld [vmem:[%s3179_s3 + $0x58] sm:$0xff]  ;;  %v1648_v5 = vld [vmem:[%s3179_s3 + $0x70] sm:$0xff] }
 0x31c   : > { %1492 = vrot.lane.b32.xlu0 %v2858_v50, %s2577_s27  ;;  %1434 = vrot.lane.b32.xlu1 %v2872_v3, %s2577_s27  ;;  %v2329_v0 = vpack.c.bf16 %v1645_v63, %v1644_v62  ;;  %p1899_p7 = scmp.eq.s32.totalorder %s3125_s26, 0 }
 0x31d   : > { %872 = vmatpush1.bf16.msra.mxu1 %v2459_v12  ;;  %1192 = vmatpush1.bf16.msra.mxu0 %v2462_v13  ;;  %v2504_v12 = vld [vmem:[%s2659_s17 + $0x210] ss:$8 sps:$4 sm:$0xff]  }
 0x31e   : > { %873 = vmatprep.subr.bf16.mxu1 %v2467_v14  ;;  %1193 = vmatprep.subr.bf16.mxu0 %v2470_v15  ;;  %v613_v13 = vld [vmem:[#allocation3 + $0x18] sm:$0xff]  ;;  %v614_v14 = vld [vmem:[#allocation3 + $0x20] sm:$0xff]  ;;  %p3131_p9 = pnand %p1900_p8, %p1899_p7 }
 0x31f   : > { %v2509_v15 = vld [vmem:[%s2659_s17 + $0x224] ss:$8 sps:$4 sm:$0xff]  }
 0x320   : > { %1068 = vmatmul.mubr.bf16.gmra.mrb[4].mxu0 %v927_v20  ;;  %779 = vmatmul.mubr.bf16.gmra.mrb[4].mxu1 %v638_v37  ;;  %v616_v20 = vpack.c.bf16 %v614_v14, %v613_v13  ;;  %v1251_v37 = vld [vmem:[#allocation3 + $0xc] sm:$0xff] }
 0x321   : > { %874 = vmatpush1.bf16.msra.mxu1 %v2465_v18  ;;  %1194 = vmatpush1.bf16.msra.mxu0 %v2468_v19  ;;  %v1420_v18 = vmax.f32 %v1416_v10, %v2808_v16  ;;  %v2894_v19 = vmax.f32 %v1421_v9, %v1425_v11 }
 0x322   : > { %875 = vmatprep.subr.bf16.mxu1 %v2473_v21  ;;  %1195 = vmatprep.subr.bf16.mxu0 %v2476_v22  ;;  %v1091_v21 = vpack.c.bf16 %v1089_v61, %v2854_v48  ;;  %v1424_v22 = vld [vmem:[#allocation4 + $0x1a] sm:$0xff]  ;;  %v1637_v48 = vld [vmem:[%s3179_s3 + $0x18] sm:$0xff] }
 0x323   : > { %1221 = vmatprep.mubr.bf16.mxu0 %v2576_v33  ;;  %901 = vmatprep.mubr.bf16.mxu1 %v2576_v33 }
 0x324   : > { %1510 = vrot.lane.b32.xlu0 %v2842_v40, %s2578_s28  ;;  %1436 = vrot.lane.b32.xlu1 %v2878_v7, %s2577_s27 }
 0x325   : > { %876 = vmatpush1.bf16.msra.mxu1 %v2471_v23  ;;  %1196 = vmatpush1.bf16.msra.mxu0 %v2474_v24  ;;  %v2507_v23 = vld [vmem:[%s2659_s17 + $0x220] ss:$8 sps:$4 sm:$0xff]   ;;  %v2512_v24 = vld [vmem:[%s2659_s17 + $0x234] ss:$8 sps:$4 sm:$0xff]  }
 0x326   : > { %877 = vmatprep.subr.bf16.mxu1 %v2479_v25  ;;  %1197 = vmatprep.subr.bf16.mxu0 %v2482_v27  ;;  %v2901_v25 = vmax.f32 %v1420_v18, %v1424_v22  ;;  %v2515_v27 = vld [vmem:[%s2659_s17 + $0x244] ss:$8 sps:$4 sm:$0xff]  }
 0x328   : > { %1455 = vrot.lane.b32.xlu0 %v2872_v3, %s2578_s28  ;;  %1508 = vrot.lane.b32.xlu1 %v2838_v38, %s2578_s28 }
 0x329   : > { %878 = vmatpush1.bf16.msra.mxu1 %v2477_v28  ;;  %1198 = vmatpush1.bf16.msra.mxu0 %v2480_v29  ;;  %v2513_v28 = vld [vmem:[%s2659_s17 + $0x240] ss:$8 sps:$4 sm:$0xff]   ;;  %v2518_v29 = vld [vmem:[%s2659_s17 + $0x254] ss:$8 sps:$4 sm:$0xff]  }
 0x32a   : > { %879 = vmatprep.subr.bf16.mxu1 %v2485_v32  ;;  %1199 = vmatprep.subr.bf16.mxu0 %v2488_v36  ;;  %v2519_v32 = vld [vmem:[%s2659_s17 + $0x260] ss:$8 sps:$4 sm:$0xff]   ;;  %s1814_s17 = sld [smem:[#allocation7 + %s593_s25]] }
 0x32b   : > { %v1250_v36 = vld [vmem:[#allocation3 + $0x4] sm:$0xff] }
 0x32c   : > { %1494 = vrot.lane.b32.xlu0 %v2882_v8, %s2577_s27  ;;  %1438 = vrot.lane.b32.xlu1 %v2901_v25, %s2577_s27  ;;  %v1254_v39 = vpack.c.bf16 %v1251_v37, %v1250_v36 }
 0x32d   : > { %880 = vmatpush1.bf16.msra.mxu1 %v2483_v41  ;;  %1200 = vmatpush1.bf16.msra.mxu0 %v2486_v42  ;;  %v1252_v41 = vld [vmem:[#allocation3 + $0x1c] sm:$0xff]  ;;  %v1253_v42 = vld [vmem:[#allocation3 + $0x24] sm:$0xff] }
 0x32e   : > { %881 = vmatprep.subr.bf16.mxu1 %v2491_v43  ;;  %1201 = vmatprep.subr.bf16.mxu0 %v2494_v45  ;;  %v1255_v43 = vpack.c.bf16 %v1253_v42, %v1252_v41  ;;  %v1635_v45 = vld [vmem:[%s3179_s3 + $0x8] sm:$0xff] }
 0x330   : > { %1440 = vrot.lane.b32.xlu0 %v2894_v19, %s2577_s27  ;;  %1457 = vrot.lane.b32.xlu1 %v2878_v7, %s2578_s28 }
 0x331   : > { %882 = vmatpush1.bf16.msra.mxu1 %v2489_v46  ;;  %1202 = vmatpush1.bf16.msra.mxu0 %v2492_v47  ;;  %v2314_v46 = vpack.c.bf16 %v1635_v45, %v1634_v44  ;;  %v2579_v47 = vmov 0.0|0.0  }
 0x332   : > { %883 = vmatprep.subr.bf16.mxu1 %v2497_v49  ;;  %1203 = vmatprep.subr.bf16.mxu0 %v2500_v51  ;;  %v1638_v51 = vld [vmem:[%s3179_s3 + $0x20] sm:$0xff] }
 0x334   : > { %1514 = vrot.lane.b32.xlu0 %v2882_v8, %s2578_s28  ;;  %1512 = vrot.lane.b32.xlu1 %v2858_v50, %s2578_s28 }
 0x335   : > { %884 = vmatpush1.bf16.msra.mxu1 %v2495_v52  ;;  %1204 = vmatpush1.bf16.msra.mxu0 %v2498_v53  ;;  %v1639_v52 = vld [vmem:[%s3179_s3 + $0x28] sm:$0xff] }
 0x336   : > { %1353 = vmatprep.subr.bf16.mxu0 %v2503_v59  ;;  %2313 = vmatprep.subr.bf16.mxu1 %v2579_v47  ;;  %v2320_v53 = vpack.c.bf16 %v1639_v52, %v1638_v51  ;;  %v2326_v59 = vpack.c.bf16 %v1643_v58, %v1642_v57 }
 0x338   : > { %902 = vmatmul.mubr.bf16.vlgmr.msra.gmra.mrb[0].mxu1 %v615_v1  ;;  %1222 = vmatmul.mubr.bf16.vlgmr.msra.gmra.mrb[0].mxu0 %v1090_v2  ;;  %v1646_v1 = vld [vmem:[%s3179_s3 + $0x60] sm:$0xff]  ;;  %v1647_v2 = vld [vmem:[%s3179_s3 + $0x68] sm:$0xff] }
 0x339   : > { %1354 = vmatpush1.bf16.msra.mxu0 %v2501_v6  ;;  %911 = vmatprep.mubr.bf16.mxu1 %v2576_v33  ;;  %v2332_v4 = vpack.c.bf16 %v1647_v2, %v1646_v1  ;;  %v1649_v6 = vld [vmem:[%s3179_s3 + $0x78] sm:$0xff] }
 0x33a   : > { %1355 = vmatprep.subr.bf16.mxu0 %v2506_v60  ;;  %1231 = vmatprep.mubr.bf16.mxu0 %v2576_v33  ;;  %v2581_v60 = vmov 0.0   ;;  %v2335_v61 = vpack.c.bf16 %v1649_v6, %v1648_v5 }
 0x33b   : > { %1459 = vrot.lane.b32.xlu1 %v2901_v25, %s2578_s28  ;;  %2315 = vmatpush3.bf16.msra.mxu1 %v2314_v46 }
 0x33c   : > { %2316 = vmatprep.subr.bf16.mxu1 %v2579_v47 }
 0x33d   : > { %1356 = vmatpush1.bf16.msra.mxu0 %v2504_v12 }
 0x33e   : > { %1357 = vmatprep.subr.bf16.mxu0 %v2509_v15 }
 0x33f   : > { %1461 = vrot.lane.b32.xlu1 %v2894_v19, %s2578_s28  ;;  %s1816_s28 = sadd.s32 5, %s2753_s24  ;;  %s2150_s24 = sshll.u32 (!%p3131_p9), %s3114_s20, 5 }
 0x340   : > { %912 = vmatmul.mubr.bf16.gmra.mrb[4].mxu1 %v616_v20  ;;  %1232 = vmatmul.mubr.bf16.gmra.mrb[4].mxu0 %v1091_v21  ;;  %s1817_s10 = sld [smem:[#allocation7 + %s1816_s28]]  ;;  %s1906_s11 = scalar_lea.vmem (!%p3131_p9), [#allocation2], %s2150_s24 }
 0x341   : > { %1358 = vmatpush1.bf16.msra.mxu0 %v2507_v23  ;;  %1385 = vmatprep.mubr.bf16.mxu0 %v2576_v33 }
 0x342   : > { %1359 = vmatprep.subr.bf16.mxu0 %v2512_v24  ;;  %2281 = vmatprep.mubr.msk.f32.mxu1 %vm2580_vm5, %v2581_v60 }
 0x345   : > { %1360 = vmatpush1.bf16.msra.mxu0 %v2510_v26 }
 0x346   : > { %1361 = vmatprep.subr.bf16.mxu0 %v2515_v27 }
 0x349   : > { %1362 = vmatpush1.bf16.msra.mxu0 %v2513_v28 }
 0x34a   : > { %1363 = vmatprep.subr.bf16.mxu0 %v2518_v29 }
 0x34d   : > { %1364 = vmatpush1.bf16.msra.mxu0 %v2516_v30 }
 0x34e   : > { %1365 = vmatprep.subr.bf16.mxu0 %v2521_v31 }
 0x351   : > { %1366 = vmatpush1.bf16.msra.mxu0 %v2519_v32 }
 0x352   : > { %1367 = vmatprep.subr.bf16.mxu0 %v2524_v34 }
 0x355   : > { %1368 = vmatpush1.bf16.msra.mxu0 %v2522_v35 }
 0x358   : > { %1386 = vmatmul.mubr.bf16.vlgmr.msra.gmra.mrb[0].mxu0 %v1254_v39 }
 0x359   : > { %1395 = vmatprep.mubr.bf16.mxu0 %v2576_v33  ;;  %v1636_v33 = vld [vmem:[%s3179_s3 + $0x10] sm:$0xff] }
 0x35a   : > { %v2317_v49 = vpack.c.bf16 %v1637_v48, %v1636_v33 }
 0x35c   : > { %2318 = vmatpush3.bf16.msra.mxu1 %v2317_v49 }
 0x35d   : > { %2319 = vmatprep.subr.bf16.mxu1 %v2579_v47 }
 0x360   : > { %1396 = vmatmul.mubr.bf16.gmra.mrb[4].mxu0 %v1255_v43  ;;  %2321 = vmatpush3.bf16.msra.mxu1 %v2320_v53 }
 0x361   : > { %2322 = vmatprep.subr.bf16.mxu1 %v2579_v47 }
 0x364   : > { %2324 = vmatpush3.bf16.msra.mxu1 %v2323_v56 }
 0x365   : > { %2325 = vmatprep.subr.bf16.mxu1 %v2579_v47 }
 0x368   : > { %2327 = vmatpush3.bf16.msra.mxu1 %v2326_v59 }
 0x369   : > { %2328 = vmatprep.subr.bf16.mxu1 %v2579_v47 }
 0x36c   : > { %2330 = vmatpush3.bf16.msra.mxu1 %v2329_v0 }
 0x36d   : > { %2331 = vmatprep.subr.bf16.mxu1 %v2579_v47 }
 0x370   : > { %2333 = vmatpush3.bf16.msra.mxu1 %v2332_v4 }
 0x371   : > { %2334 = vmatprep.subr.bf16.mxu1 %v2579_v47 }
 0x374   : > { %2336 = vmatpush3.bf16.msra.mxu1 %v2335_v61 }
 0x375   : > { %2284 = vmatprep.subr.mxu1 %v2581_v60 }
 0x382   : > { %v1489_v9 = vpop.permute.xlu0 %1488 }
 0x383   : > { %v1500_v29 = vsel %vm1446_vm6, 0.0, %v1489_v9 }
 0x384   : > { %v1504_v32 = vadd.f32 %v1500_v29, %v2838_v38 }
 0x386   : > { %v1491_v11 = vpop.permute.xlu0 %1490 }
 0x387   : > { %v1501_v28 = vsel %vm1446_vm6, 0.0, %v1491_v11 }
 0x388   : > { %v1505_v30 = vadd.f32 %v1501_v28, %v2842_v40 }
 0x38e   : > { %v1435_v10 = vpop.permute.xlu1 %1434  ;;  %v1493_v13 = vpop.permute.xlu0 %1492 }
 0x38f   : > { %v1502_v37 = vsel %vm1446_vm6, 0.0, %v1493_v13  ;;  %v1447_v42 = vsel %vm1446_vm6, -1e+30, %v1435_v10 }
 0x390   : > { %v1506_v38 = vadd.f32 %v1502_v37, %v2858_v50  ;;  %v1451_v47 = vmax.f32 %v1447_v42, %v2872_v3 }
 0x396   : > { %v1437_v12 = vpop.permute.xlu1 %1436  ;;  %v1511_v15 = vpop.permute.xlu0 %1510 }
 0x397   : > { %v1521_v34 = vsel %vm1467_vm7, %v1511_v15, 0.0  ;;  %v1448_v43 = vsel %vm1446_vm6, -1e+30, %v1437_v12 }
 0x398   : > { %v1525_v40 = vadd.f32 %v1521_v34, %v1505_v30  ;;  %v1452_v33 = vmax.f32 %v1448_v43, %v2878_v7 }
 0x39a   : > { %v1509_v14 = vpop.permute.xlu1 %1508  ;;  %v1456_v20 = vpop.permute.xlu0 %1455  ;;  %v3012_v56 = vmul.f32 0.11111111, %v1525_v40 }
 0x39b   : > { %v1520_v39 = vsel %vm1467_vm7, %v1509_v14, 0.0  ;;  %v1468_v53 = vsel %vm1467_vm7, %v1456_v20, -1e+30 }
 0x39c   : > { %v1524_v46 = vadd.f32 %v1520_v39, %v1504_v32  ;;  %v3018_v58 = vmax.f32 %v1451_v47, %v1468_v53  ;;  %v1582_v1 = vmul.f32 %v3012_v56, %v3012_v56 }
 0x39e   : > { %v1439_v18 = vpop.permute.xlu1 %1438  ;;  %v1495_v24 = vpop.permute.xlu0 %1494  ;;  %v3014_v50 = vmul.f32 0.11111111, %v1524_v46  ;;  %v1568_v10 = vmul.f32 %v3018_v58, %v3018_v58 }
 0x39f   : > { %v1503_v48 = vsel %vm1446_vm6, 0.0, %v1495_v24  ;;  %v1449_v52 = vsel %vm1446_vm6, -1e+30, %v1439_v18 }
 0x3a0   : > { %v1507_v3 = vadd.f32 %v1503_v48, %v2882_v8  ;;  %v1453_v7 = vmax.f32 %v1449_v52, %v2901_v25  ;;  %v1581_v8 = vmul.f32 %v3014_v50, %v3014_v50  ;;  %v1541_v25 = vadd.f32 %v3012_v56, %v3014_v50 }
 0x3a2   : > { %v1458_v22 = vpop.permute.xlu1 %1457  ;;  %v1441_v35 = vpop.permute.xlu0 %1440  ;;  %v1585_v13 = vadd.f32 %v1582_v1, %v1581_v8 }
 0x3a3   : > { %v1469_v54 = vsel %vm1467_vm7, %v1458_v22, -1e+30  ;;  %v1450_v63 = vsel %vm1446_vm6, -1e+30, %v1441_v35 }
 0x3a4   : > { %v3020_v59 = vmax.f32 %v1452_v33, %v1469_v54  ;;  %v1454_v61 = vmax.f32 %v1450_v63, %v2894_v19 }
 0x3a6   : > { %v1513_v31 = vpop.permute.xlu1 %1512  ;;  %v1515_v55 = vpop.permute.xlu0 %1514  ;;  %v1532_v6 = vadd.f32 %v3020_v59, %v3018_v58  ;;  %v1569_v11 = vmul.f32 %v3020_v59, %v3020_v59 }
 0x3a7   : > { %v1522_v49 = vsel %vm1467_vm7, %v1513_v31, 0.0  ;;  %v1523_v62 = vsel %vm1467_vm7, %v1515_v55, 0.0 }
 0x3a8   : > { %v1526_v57 = vadd.f32 %v1522_v49, %v1506_v38  ;;  %v1527_v5 = vadd.f32 %v1523_v62, %v1507_v3  ;;  %v1572_v22 = vadd.f32 %v1569_v11, %v1568_v10 }
 0x3aa   : > { %v3031_v4 = vmul.f32 0.11111111, %v1526_v57  ;;  %v3046_v18 = vmul.f32 0.11111111, %v1527_v5 }
 0x3ac   : > { %v1542_v14 = vadd.f32 %v1541_v25, %v3031_v4  ;;  %v1583_v15 = vmul.f32 %v3031_v4, %v3031_v4  ;;  %v1584_v30 = vmul.f32 %v3046_v18, %v3046_v18 }
 0x3ad   : > { %v1460_v51 = vpop.permute.xlu1 %1459 }
 0x3ae   : > { %v1470_v0 = vsel %vm1467_vm7, %v1460_v51, -1e+30  ;;  %v1586_v28 = vadd.f32 %v1585_v13, %v1583_v15  ;;  %v1543_v29 = vadd.f32 %v1542_v14, %v3046_v18 }
 0x3af   : > { %v3036_v9 = vmax.f32 %v1453_v7, %v1470_v0 }
 0x3b0   : > { %v1544_v35 = vrot.slane %v1543_v29, 4  ;;  %v1587_v37 = vadd.f32 %v1586_v28, %v1584_v30 }
 0x3b1   : > { %v1462_v2 = vpop.permute.xlu1 %1461  ;;  %v1533_v19 = vadd.f32 %v1532_v6, %v3036_v9  ;;  %v1570_v24 = vmul.f32 %v3036_v9, %v3036_v9 }
 0x3b2   : > { %v1471_v12 = vsel %vm1467_vm7, %v1462_v2, -1e+30  ;;  %v1545_v49 = vadd.f32 %v1544_v35, %v1543_v29  ;;  %v1588_v51 = vrot.slane %v1587_v37, 4 }
 0x3b3   : > { %v3049_v20 = vmax.f32 %v1454_v61, %v1471_v12  ;;  %v1573_v32 = vadd.f32 %v1572_v22, %v1570_v24 }
 0x3b4   : > { %v1546_v55 = vrot.slane %v1545_v49, 2  ;;  %v1589_v3 = vadd.f32 %v1588_v51, %v1587_v37 }
 0x3b5   : > { %v1534_v31 = vadd.f32 %v1533_v19, %v3049_v20  ;;  %v1571_v34 = vmul.f32 %v3049_v20, %v3049_v20 }
 0x3b6   : > { %v1547_v14 = vadd.f32 %v1546_v55, %v1545_v49 }
 0x3b7   : > { %v1535_v42 = vrot.slane %v1534_v31, 4  ;;  %v1574_v38 = vadd.f32 %v1573_v32, %v1571_v34  ;;  %v1590_v34 = vrot.slane %v1589_v3, 2 }
 0x3b9   : > { %v1536_v53 = vadd.f32 %v1535_v42, %v1534_v31  ;;  %v1575_v54 = vrot.slane %v1574_v38, 4  ;;  %v1548_v42 = vrot.slane %v1547_v14, 1 }
 0x3bb   : > { %v1537_v7 = vrot.slane %v1536_v53, 2  ;;  %v1576_v0 = vadd.f32 %v1575_v54, %v1574_v38 }
 0x3bd   : > { %v1538_v24 = vadd.f32 %v1537_v7, %v1536_v53  ;;  %v1577_v30 = vrot.slane %v1576_v0, 2  ;;  %v1591_v53 = vadd.f32 %v1590_v34, %v1589_v3 }
 0x40b   : > { %v2979_v21 = vpop.f32.mrb[0].mxu1 }
 0x40c   : > { %v2981_v23 = vpop.f32.mrb[1].mxu1 }
 0x40d   : > { %v2983_v26 = vpop.f32.mrb[2].mxu1 }
 0x40e   : > { %v2985_v27 = vpop.f32.mrb[3].mxu1 }
 0x413   : > { %v2992_v36 = vpop.f32.mrb[4].mxu1 }
 0x414   : > { %v2996_v41 = vpop.f32.mrb[5].mxu1 }
 0x415   : > { %v3000_v44 = vpop.f32.mrb[6].mxu1 }
 0x416   : > { %v3002_v45 = vpop.f32.mrb[7].mxu1 }
 0x42b   : > { %v1387_v39 = vpop.f32.mrb[0].mxu0 }
 0x42c   : > { %v3060_v43 = vadd.f32 %v1387_v39, %v2979_v21  ;;  %v1389_v40 = vpop.f32.mrb[1].mxu0 }
 0x42d   : > { %v3063_v46 = vadd.f32 %v1389_v40, %v2981_v23  ;;  %v1391_v47 = vpop.f32.mrb[2].mxu0  ;;  %v1539_v40 = vrot.slane %v1538_v24, 1 }
 0x42e   : > { %v3066_v33 = vadd.f32 %v1391_v47, %v2983_v26  ;;  %v1393_v48 = vpop.f32.mrb[3].mxu0  ;;  %v1594_v26 = vmul.f32 %v3060_v43, %v3060_v43 }
 0x42f   : > { %v3069_v52 = vadd.f32 %v1393_v48, %v2985_v27  ;;  %v1607_v1 = vmul.f32 %v3063_v46, %v3063_v46  ;;  %v1578_v48 = vadd.f32 %v1577_v30, %v1576_v0  ;;  %v1540_v7 = vadd.f32 %v1539_v40, %v1538_v24  ;;  %v1738_v30 = vld [vmem:[%s3180_s4] sm:$0xff] }
 0x430   : > { %v1595_v21 = vmul.f32 %v3066_v33, %v3066_v33  ;;  %v1550_v62 = vadd.f32 %v3066_v33, %v3060_v43 }
 0x431   : > { %v1608_v23 = vmul.f32 %v3069_v52, %v3069_v52  ;;  %v1559_v2 = vadd.f32 %v3069_v52, %v3063_v46 }
 0x432   : > { %v1598_v5 = vadd.f32 %v1595_v21, %v1594_v26 }
 0x433   : > { %v1397_v57 = vpop.f32.mrb[4].mxu0  ;;  %v1611_v11 = vadd.f32 %v1608_v23, %v1607_v1 }
 0x434   : > { %v3080_v27 = vadd.f32 %v1397_v57, %v2992_v36  ;;  %v1399_v63 = vpop.f32.mrb[5].mxu0  ;;  %v1549_v57 = vadd.f32 %v1548_v42, %v1547_v14 }
 0x435   : > { %v3087_v8 = vadd.f32 %v1399_v63, %v2996_v41  ;;  %v1401_v25 = vpop.f32.mrb[6].mxu0  ;;  %v1579_v63 = vrot.slane %v1578_v48, 1 }
 0x436   : > { %v1551_v6 = vadd.f32 %v3080_v27, %v1550_v62  ;;  %v1596_v61 = vmul.f32 %v3080_v27, %v3080_v27  ;;  %v3093_v36 = vadd.f32 %v1401_v25, %v3000_v44  ;;  %v1403_v10 = vpop.f32.mrb[7].mxu0  ;;  %v1592_v25 = vrot.slane %v1591_v53, 1 }
 0x437   : > { %v1560_v12 = vadd.f32 %v3087_v8, %v1559_v2  ;;  %v1609_v13 = vmul.f32 %v3087_v8, %v3087_v8  ;;  %v3099_v41 = vadd.f32 %v1403_v10, %v3002_v45  ;;  %v1621_v3 = vsel %vm1620_vm8, %v1540_v7, %v1549_v57 }
 0x438   : > { %v1599_v15 = vadd.f32 %v1598_v5, %v1596_v61  ;;  %v1552_v19 = vadd.f32 %v3093_v36, %v1551_v6  ;;  %v1597_v22 = vmul.f32 %v3093_v36, %v3093_v36  ;;  %v1593_v14 = vadd.f32 %v1592_v25, %v1591_v53 }
 0x439   : > { %v1612_v44 = vadd.f32 %v1611_v11, %v1609_v13  ;;  %v1561_v28 = vadd.f32 %v3099_v41, %v1560_v12  ;;  %v1610_v29 = vmul.f32 %v3099_v41, %v3099_v41  ;;  %v1580_v12 = vadd.f32 %v1579_v63, %v1578_v48 }
 0x43a   : > { %v1553_v31 = vrot.slane %v1552_v19, 4  ;;  %v1600_v32 = vadd.f32 %v1599_v15, %v1597_v22  ;;  %v1882_v7 = vstv %s1817_s10 }
 0x43b   : > { %v1562_v45 = vrot.slane %v1561_v28, 4  ;;  %v1613_v35 = vadd.f32 %v1612_v44, %v1610_v29 }
 0x43c   : > { %v1554_v37 = vadd.f32 %v1553_v31, %v1552_v19  ;;  %v1601_v39 = vrot.slane %v1600_v32, 4 }
 0x43d   : > { %v1563_v38 = vadd.f32 %v1562_v45, %v1561_v28  ;;  %v1614_v47 = vrot.slane %v1613_v35, 4 }
 0x43e   : > { %v1555_v49 = vrot.slane %v1554_v37, 2  ;;  %v1602_v51 = vadd.f32 %v1601_v39, %v1600_v32 }
 0x43f   : > { %v1564_v54 = vrot.slane %v1563_v38, 2  ;;  %v1615_v21 = vadd.f32 %v1614_v47, %v1613_v35 }
 0x440   : > { %v1556_v55 = vadd.f32 %v1555_v49, %v1554_v37  ;;  %v1603_v23 = vrot.slane %v1602_v51, 2 }
 0x441   : > { %v1565_v26 = vadd.f32 %v1564_v54, %v1563_v38  ;;  %v1616_v62 = vrot.slane %v1615_v21, 2  ;;  %v1818_v54 = vstv %s1812_s30 }
 0x442   : > { %v1557_v1 = vrot.slane %v1556_v55, 1  ;;  %v1604_v2 = vadd.f32 %v1603_v23, %v1602_v51  ;;  %v1838_v51 = vlaneseq  ;;  %v1832_v23 = vstv %s1815_s9 }
 0x443   : > { %v1566_v5 = vrot.slane %v1565_v26, 1  ;;  %v1617_v6 = vadd.f32 %v1616_v62, %v1615_v21  ;;  %v1820_v21 = vstv %s1813_s8 }
 0x444   : > { %v1558_v0 = vadd.f32 %v1557_v1, %v1556_v55  ;;  %v1605_v61 = vrot.slane %v1604_v2, 1  ;;  %v3136_v53 = vshrl.u32 %v1838_v51, 7  ;;  %v1826_v55 = vstv %s1814_s17 }
 0x445   : > { %v1567_v10 = vadd.f32 %v1566_v5, %v1565_v26  ;;  %v1618_v11 = vrot.slane %v1617_v6, 1  ;;  %v1886_v51 = vmul.f32 %v1882_v7, %v2812_v17 }
 0x446   : > { %v1623_v13 = vsel %vm1622_vm9, %v1621_v3, %v1558_v0  ;;  %v1606_v19 = vadd.f32 %v1605_v61, %v1604_v2  ;;  %v1840_v57 = vsub.s32 0, %v3136_v53  ;;  %v1848_v62 = vsub.s32 1, %v3136_v53  ;;  %v2527_v61 = vld [vmem:[#allocation3 + $0x2] sm:$0xff] }
 0x447   : > { %v1625_v15 = vsel %vm1624_vm10, %v1623_v13, %v1567_v10  ;;  %v1619_v24 = vadd.f32 %v1618_v11, %v1617_v6  ;;  %v1860_v63 = vsub.s32 2, %v3136_v53  ;;  %v1872_v1 = vsub.s32 3, %v3136_v53  ;;  %v2528_v10 = vld [vmem:[#allocation3 + $0xa] sm:$0xff] }
 0x448   : > { %v1627_v22 = vsel %vm1626_vm11, %v1625_v15, %v1580_v12  ;;  %v1883_v3 = vmul.f32 %v2527_v61, %v1882_v7  ;;  %v1884_v11 = vmul.f32 %v2528_v10, %v1882_v7  ;;  %v1885_v12 = vmul.f32 %v1882_v7, %v2808_v16 }
 0x449   : > { %v1629_v44 = vsel %vm1628_vm12, %v1627_v22, %v1593_v14 }
 0x44a   : > { %v1631_v28 = vsel %vm1630_vm13, %v1629_v44, %v1606_v19  ;;  %v1893_v19 = vsub.s32 4, %v3136_v53 }
 0x44b   : > { %v1633_v29 = vsel %vm1632_vm14, %v1631_v28, %v1619_v24 }
 0x44c   : > { %2282 = vmatmul.mubr.f32.vlgmr.msra.gmra.mrb[8].mxu1 %v1633_v29 }
 0x44d   : > { %2286 = vmatprep.mubr.msk.f32.mxu1 %vm2580_vm5, %v2581_v60  ;;  %2285 = vmatpush3.msra.mxu1 %v1738_v30 }
 0x51f   : > { %v1716_v31 = vpop.f32.mrb[8].mxu1 }
 0x520   : > { %v1720_v32 = vmul.f32 0.001953125, %v1716_v31  ;;  %v2283_v34 = vpop.f32.mrb[9].mxu1 }
 0x522   : > { %v1721_v45 = vmul.f32 %v1720_v32, %v1720_v32  ;;  %v1729_v40 = vsub.f32 0.0, %v1720_v32 }
 0x524   : > { %v1723_v35 = vrot.slane %v1721_v45, 4 }
 0x526   : > { %v1725_v37 = vsub.f32 %v1720_v32, %v1723_v35 }
 0x528   : > { %v1726_v60 = vmax.f32 %v1725_v37, 0.0 }
 0x52a   : > { %v1727_v39 = vadd.f32 1e-05, %v1726_v60 }
 0x52c   : > { %2525 = vrsqrt.f32 %v1727_v39 }
 0x536   : > { %v2526_v42 = vpop.eup %2525 }
 0x537   : > { %v1731_v38 = vrot.slane %v2526_v42, 4 }
 0x539   : > { %v1733_v47 = vmul.f32 %v1731_v38, %v1729_v40 }
 0x53b   : > { %v1735_v48 = vrot.slane %v1733_v47, 4 }
 0x53d   : > { %v1737_v49 = vsel %vm1626_vm11, %v1731_v38, %v1735_v48 }
 0x53e   : > { %2287 = vmatmul.mubr.msk.f32.vlgmr.msra.gmra.mrb[10].mxu1 %vm1446_vm6, %v1737_v49 }
 0x611   : > { %v1808_v26 = vpop.f32.mrb[10].mxu1 }
 0x612   : > { %v1819_v2 = vmul.f32 %v1818_v54, %v1808_v26  ;;  %v1821_v25 = vmul.f32 %v1820_v21, %v1808_v26  ;;  %v1827_v5 = vmul.f32 %v1826_v55, %v1808_v26  ;;  %v1833_v6 = vmul.f32 %v1832_v23, %v1808_v26  ;;  %v2288_v0 = vpop.f32.mrb[11].mxu1 }
 0x614   : > { %v1823_v13 = vrot.slane %v1821_v25, 1  ;;  %v1829_v14 = vrot.slane %v1827_v5, 2  ;;  %v1841_v15 = vrot.slane %v1819_v2, %v1840_v57  ;;  %v1835_v22 = vrot.slane %v1833_v6, 3 }
 0x615   : > { %v1849_v24 = vrot.slane %v1821_v25, %v1848_v62  ;;  %v1861_v44 = vrot.slane %v1827_v5, %v1860_v63  ;;  %v1873_v28 = vrot.slane %v1833_v6, %v1872_v1 }
 0x616   : > { %v1825_v29 = vadd.f32 %v1823_v13, %v1819_v2  ;;  %v1842_v30 = vmul.f32 %v1841_v15, %v3018_v58  ;;  %v1843_v31 = vmul.f32 %v1841_v15, %v3020_v59  ;;  %v1844_v32 = vmul.f32 %v1841_v15, %v3036_v9 }
 0x617   : > { %v1845_v34 = vmul.f32 %v1841_v15, %v3049_v20  ;;  %v1850_v16 = vmul.f32 %v1849_v24, %v3014_v50  ;;  %v1851_v45 = vmul.f32 %v1849_v24, %v3012_v56  ;;  %v1852_v35 = vmul.f32 %v1849_v24, %v3031_v4 }
 0x618   : > { %v1831_v37 = vadd.f32 %v1829_v14, %v1825_v29  ;;  %v1853_v60 = vmul.f32 %v1849_v24, %v3046_v18  ;;  %v1862_v39 = vmul.f32 %v3060_v43, %v1861_v44  ;;  %v1863_v42 = vmul.f32 %v3066_v33, %v1861_v44 }
 0x619   : > { %v1854_v58 = vadd.f32 %v1850_v16, %v1842_v30  ;;  %v1855_v40 = vadd.f32 %v1851_v45, %v1843_v31  ;;  %v1856_v59 = vadd.f32 %v1852_v35, %v1844_v32  ;;  %v1864_v9 = vmul.f32 %v3080_v27, %v1861_v44 }
 0x61a   : > { %v1837_v38 = vadd.f32 %v1835_v22, %v1831_v37  ;;  %v1857_v20 = vadd.f32 %v1853_v60, %v1845_v34  ;;  %v1865_v50 = vmul.f32 %v3093_v36, %v1861_v44  ;;  %v1874_v56 = vmul.f32 %v3063_v46, %v1873_v28 }
 0x61b   : > { %v1866_v47 = vadd.f32 %v1862_v39, %v1854_v58  ;;  %v1867_v4 = vadd.f32 %v1863_v42, %v1855_v40  ;;  %v1868_v48 = vadd.f32 %v1864_v9, %v1856_v59  ;;  %v1875_v18 = vmul.f32 %v3069_v52, %v1873_v28 }
 0x61c   : > { %v1869_v49 = vadd.f32 %v1865_v50, %v1857_v20  ;;  %v1876_v43 = vmul.f32 %v3087_v8, %v1873_v28  ;;  %v1877_v33 = vmul.f32 %v3099_v41, %v1873_v28  ;;  %v1894_v23 = vrot.slane %v1837_v38, %v1893_v19  ;;  %1904 = sbr.rel (%p3131_p9) target bundleno = 1573 (0x625), region = 56 }
 0x61d   : > { %v1878_v53 = vadd.f32 %v1874_v56, %v1866_v47  ;;  %v1879_v27 = vadd.f32 %v1875_v18, %v1867_v4 }
 0x61e   : > { %v1880_v54 = vadd.f32 %v1876_v43, %v1868_v48  ;;  %v1881_v21 = vadd.f32 %v1877_v33, %v1869_v49 }
 0x61f   : > { %v1887_v55 = vadd.f32 %v1883_v3, %v1878_v53  ;;  %v1888_v36 = vadd.f32 %v1884_v11, %v1879_v27 }
 0x620   : > { %v1889_v46 = vadd.f32 %v1885_v12, %v1880_v54  ;;  %v1890_v57 = vadd.f32 %v1886_v51, %v1881_v21 }
 0x621   : > { %v1895_v26 = vadd.f32 %v1894_v23, %v1887_v55  ;;  %v1896_v62 = vadd.f32 %v1894_v23, %v1888_v36 }
 0x622   : > { %v1897_v63 = vadd.f32 %v1894_v23, %v1889_v46  ;;  %v1898_v52 = vadd.f32 %v1894_v23, %v1890_v57 }
 0x623   : > { %1907 = vst [vmem:[%s1906_s11] sm:$0xff] %v1895_v26  ;;  %1908 = vst [vmem:[%s1906_s11 + $0x8] sm:$0xff] %v1896_v62 }
 0x624   : > { %1909 = vst [vmem:[%s1906_s11 + $0x10] sm:$0xff] %v1897_v63  ;;  %1910 = vst [vmem:[%s1906_s11 + $0x18] sm:$0xff] %v1898_v52 }
 0x625 PF: > { %p1911_p10 = scmp.eq.s32.totalorder %s3123_s0, 0 }
 0x627   : > { %p1912_p11 = pnand %p1911_p10, %p1899_p7 }
 0x628   : > { %s2151_s12 = sshll.u32 (!%p1912_p11), %s3114_s20, 5 }
 0x629   : > { %1915 = sbr.rel (%p1912_p11) target bundleno = 1584 (0x630), region = 60  ;;  %s1917_s13 = scalar_lea.vmem (!%p1912_p11), [#allocation2], %s2151_s12 }
 0x62b   : > { %v1918_v17 = vld [vmem:[%s1917_s13] sm:$0xff] (!%p1912_p11)  ;;  %v1919_v8 = vld [vmem:[%s1917_s13 + $0x8] sm:$0xff] (!%p1912_p11)  ;;  %v1920_v41 = vld [vmem:[%s1917_s13 + $0x10] sm:$0xff] (!%p1912_p11) }
 0x62c   : > { %v1922_v7 = vadd.f32 (!%p1912_p11), %v1918_v17, %v1895_v26  ;;  %v1923_v1 = vadd.f32 (!%p1912_p11), %v1919_v8, %v1896_v62  ;;  %v1924_v2 = vadd.f32 (!%p1912_p11), %v1920_v41, %v1897_v63  ;;  %v1921_v25 = vld [vmem:[%s1917_s13 + $0x18] sm:$0xff] (!%p1912_p11) }
 0x62d   : > { %v1925_v5 = vadd.f32 (!%p1912_p11), %v1921_v25, %v1898_v52 }
 0x62e   : > { %1926 = vst [vmem:[%s1917_s13] sm:$0xff] (!%p1912_p11), %v1922_v7  ;;  %1927 = vst [vmem:[%s1917_s13 + $0x8] sm:$0xff] (!%p1912_p11), %v1923_v1 }
 0x62f   : > { %1928 = vst [vmem:[%s1917_s13 + $0x10] sm:$0xff] (!%p1912_p11), %v1924_v2  ;;  %1929 = vst [vmem:[%s1917_s13 + $0x18] sm:$0xff] (!%p1912_p11), %v1925_v5 }
 0x630 PF: > { %p2152_p12 = scmp.ne.s32.totalorder %s3125_s26, 1 }
 0x631   : > { %s2153_s14 = sshll.u32 (!%p2152_p12), %s3117_s22, 5 }
 0x632   : > { %1933 = sbr.rel (%p2152_p12) target bundleno = 1593 (0x639), region = 64  ;;  %s1935_s18 = scalar_lea.vmem (!%p2152_p12), %s3183_s7, %s2153_s14 }
 0x633   : > { %1936 = vst [vmem:[%s1935_s18] sm:$0xff] (!%p2152_p12), %v1895_v26  ;;  %1937 = vst [vmem:[%s1935_s18 + $0x8] sm:$0xff] (!%p2152_p12), %v1896_v62 }
 0x634   : > { %1938 = vst [vmem:[%s1935_s18 + $0x10] sm:$0xff] (!%p2152_p12), %v1897_v63  ;;  %1939 = vst [vmem:[%s1935_s18 + $0x18] sm:$0xff] (!%p2152_p12), %v1898_v52 }
 0x639 PF: > { %s24_s29 = sadd.s32 1, %s2568_s29  }
 0x63a   : > { %p21_p13 = scmp.ge.s32.totalorder %s24_s29, 8  }
 0x63c   :  { %23 = sbr.rel (!%p21_p13) target bundleno = 16 (0x10), region = 99 }
 0x643   :  { %1951 = vsyncpa [#allocation8], 1 }
 0x644   :  { %1953 = vsyncpa [#allocation8 + $0x1], 1 }

</bundles_post_ra>
